<compile_context>
chip_gen: v7x
topology: tpu7x:2x2x1
jax: 0.10.0
libtpu: 0.0.40
codegen_flags: <defaults>
</compile_context>

<pallas_src>
import jax
import jax.numpy as jnp
from jax import lax
from jax.experimental import pallas as pl
from jax.experimental.pallas import tpu as pltpu

LANE = 128
SUBLANE = 8


def _round_up(x, m):
    return (x + m - 1) // m * m


def encoder_kernel(obs_ref, wc_ref, bc_ref, whh_ref, out_ref, gx_scr):
    """One batch-tile of the Encoder forward.

    obs_ref : (T, Bt, 2)            f32  input positions (batch tile)
    wc_ref  : (2, 4*H_pad)          f32  folded input weight  W_emb @ W_ih,
                                         gate order i,f,o,g, one gate / 128-lane slab
    bc_ref  : (1, 4*H_pad)          f32  folded bias  b_emb @ W_ih + b_ih + b_hh
    whh_ref : (H_pad, 4*H_pad)      bf16 hidden-to-hidden weight (padded rows/lanes zero)
    out_ref : (1, Bt, H_pad)        f32  final hidden state (lane-dense store)
    gx_scr  : (T, Bt, 4*H_pad)      f32  VMEM scratch: input-side gate pre-activations
    """
    T, Bt, _ = obs_ref.shape
    H_pad = out_ref.shape[2]

    # ---- input projection for ALL timesteps, hoisted off the serial chain.
    # Linear(2 -> 4*H_pad) as two lane-broadcast FMAs (K=2 is degenerate for
    # the MXU); bias is folded in here so the loop has no per-step bias add.
    x = obs_ref[...]                                            # (T, Bt, 2)
    wc = wc_ref[...]                                            # (2, 4*H_pad)
    gx_scr[...] = (x[:, :, 0:1] * wc[0:1, :][None, :, :]
                   + x[:, :, 1:2] * wc[1:2, :][None, :, :]
                   + bc_ref[...][None, :, :])

    # h0 = c0 = 0  (matches Encoder.init_hidden).  Padded lanes stay exactly 0
    # through the recurrence (pre-activations 0 -> i,f,o=0.5, g=0 -> c=h=0).
    h0 = jnp.zeros((Bt, H_pad), jnp.float32)
    c0 = jnp.zeros((Bt, H_pad), jnp.float32)

    def step(t, carry):
        h, c = carry
        # Serial-path matmul only: (Bt, H_pad) @ (H_pad, 4*H_pad), bf16 MXU,
        # f32 accumulation; input-side contribution comes from the scratch.
        gates = gx_scr[t] + jnp.dot(h.astype(jnp.bfloat16), whh_ref[...],
                                    preferred_element_type=jnp.float32)
        # Gate order i, f, o, g: one contiguous sigmoid over 3 slabs, tanh on
        # the last slab; all slices 128-lane aligned.
        sig = jax.nn.sigmoid(gates[:, 0:3 * H_pad])
        i_g = sig[:, 0 * H_pad:1 * H_pad]
        f_g = sig[:, 1 * H_pad:2 * H_pad]
        o_g = sig[:, 2 * H_pad:3 * H_pad]
        g_g = jnp.tanh(gates[:, 3 * H_pad:4 * H_pad])
        c_new = f_g * c + i_g * g_g
        h_new = o_g * jnp.tanh(c_new)
        return (h_new, c_new)

    h_T, _ = lax.fori_loop(0, T, step, (h0, c0), unroll=True)
    out_ref[0] = h_T                                            # lane-dense store


def encoder_forward(obs_traj, params, *, batch_tile=None):
    """obs_traj: (T, B, 2) float32 -> final_h: (1, B, h_dim) float32."""
    T, B, _ = obs_traj.shape
    H = params["h_dim"]
    H_pad = params["whh_p"].shape[0]
    G = params["whh_p"].shape[1]                   # 4 * H_pad
    num_layers = 1

    # Larger batch tiles -> better MXU row utilization and fewer grid steps;
    # multiple tiles shard across TensorCores on multi-TC chips (v7x).
    if batch_tile is None:
        batch_tile = min(_round_up(B, SUBLANE), 128)
    Bt = batch_tile
    B_pad = _round_up(B, Bt)

    # Pad batch; padded rows produce harmless values sliced off below.
    obs_p = jnp.zeros((T, B_pad, 2), jnp.float32)
    obs_p = obs_p.at[:, :B, :].set(obs_traj.astype(jnp.float32))

    out = pl.pallas_call(
        encoder_kernel,
        out_shape=jax.ShapeDtypeStruct((num_layers, B_pad, H_pad), jnp.float32),
        grid=(B_pad // Bt,),
        in_specs=[
            pl.BlockSpec((T, Bt, 2), lambda i: (0, i, 0)),
            pl.BlockSpec((2, G), lambda i: (0, 0)),
            pl.BlockSpec((1, G), lambda i: (0, 0)),
            pl.BlockSpec((H_pad, G), lambda i: (0, 0)),
        ],
        out_specs=pl.BlockSpec((num_layers, Bt, H_pad), lambda i: (0, i, 0)),
        scratch_shapes=[pltpu.VMEM((T, Bt, G), jnp.float32)],
        compiler_params=pltpu.CompilerParams(
            dimension_semantics=("parallel",)),
    )(obs_p, params["wc_p"], params["bc_p"], params["whh_p"])

    return out[:, :B, :H]


def make_params(key, embedding_dim=64, h_dim=64):
    """Deterministic synthetic parameters (PyTorch-like uniform init) plus the
    folded / padded kernel-side layout."""
    E, H = embedding_dim, h_dim
    H_pad = _round_up(H, LANE)

    ks = jax.random.split(key, 6)
    lin_s = 1.0 / jnp.sqrt(2.0)
    lstm_s = 1.0 / jnp.sqrt(float(H))

    wemb = jax.random.uniform(ks[0], (2, E), jnp.float32, -lin_s, lin_s)
    bemb = jax.random.uniform(ks[1], (1, E), jnp.float32, -lin_s, lin_s)

    # (in_features, out_features) layout, PyTorch gate order i, f, g, o.
    w_ih = jax.random.uniform(ks[2], (E, 4 * H), jnp.float32, -lstm_s, lstm_s)
    w_hh = jax.random.uniform(ks[3], (H, 4 * H), jnp.float32, -lstm_s, lstm_s)
    b_ih = jax.random.uniform(ks[4], (4 * H,), jnp.float32, -lstm_s, lstm_s)
    b_hh = jax.random.uniform(ks[5], (4 * H,), jnp.float32, -lstm_s, lstm_s)
    b = b_ih + b_hh

    # ---- algebraic fold of the spatial embedding into the input projection
    # (done in f32, mathematically exact):
    #   gates_x = obs @ (W_emb @ W_ih) + (b_emb @ W_ih + b_ih + b_hh)
    w_comb = jnp.dot(wemb, w_ih)                     # (2, 4H)
    b_comb = jnp.dot(bemb, w_ih)[0] + b              # (4H,)

    # ---- kernel-side layout: gate order i, f, o, g; each gate in its own
    # 128-lane slab; padded lanes / rows stay zero (padding invariant).
    gate_src = (0, 1, 3, 2)                          # kernel slab k <- torch gate
    wc_p = jnp.zeros((2, 4 * H_pad), jnp.float32)
    bc_p = jnp.zeros((1, 4 * H_pad), jnp.float32)
    whh_p = jnp.zeros((H_pad, 4 * H_pad), jnp.float32)
    for k, src in enumerate(gate_src):
        wc_p = wc_p.at[:, k * H_pad:k * H_pad + H].set(
            w_comb[:, src * H:(src + 1) * H])
        bc_p = bc_p.at[0, k * H_pad:k * H_pad + H].set(
            b_comb[src * H:(src + 1) * H])
        whh_p = whh_p.at[:H, k * H_pad:k * H_pad + H].set(
            w_hh[:, src * H:(src + 1) * H])
    whh_p = whh_p.astype(jnp.bfloat16)               # MXU-native, halves weight DMA

    return dict(
        embedding_dim=E, h_dim=H,
        # reference (unfolded, unpadded) parameters
        wemb=wemb, bemb=bemb, w_ih=w_ih, w_hh=w_hh, b=b,
        # kernel (folded / padded) parameters
        wc_p=wc_p, bc_p=bc_p, whh_p=whh_p,
    )


def encoder_reference(obs_traj, params):
    """Pure-JAX reference mirroring the PyTorch module (f32 input path,
    bf16-staged hidden-to-hidden matmul like the kernel)."""
    T, B, _ = obs_traj.shape
    H = params["h_dim"]

    e = jnp.einsum("tbc,ce->tbe", obs_traj, params["wemb"]) \
        + params["bemb"][None]                                     # (T, B, E)
    gx = jnp.einsum("tbe,eg->tbg", e, params["w_ih"]) \
        + params["b"][None, None, :]                               # (T, B, 4H)

    w_hh = params["w_hh"].astype(jnp.bfloat16)

    def step(carry, g_x):
        h, c = carry
        gates = g_x + jnp.dot(h.astype(jnp.bfloat16), w_hh,
                              preferred_element_type=jnp.float32)
        i = jax.nn.sigmoid(gates[:, 0 * H:1 * H])
        f = jax.nn.sigmoid(gates[:, 1 * H:2 * H])
        g = jnp.tanh(gates[:, 2 * H:3 * H])
        o = jax.nn.sigmoid(gates[:, 3 * H:4 * H])
        c_new = f * c + i * g
        h_new = o * jnp.tanh(c_new)
        return (h_new, c_new), None

    h0 = jnp.zeros((B, H), jnp.float32)
    c0 = jnp.zeros((B, H), jnp.float32)
    (h_T, _), _ = lax.scan(step, (h0, c0), gx)
    return h_T[None]


if __name__ == "__main__":
    obs_len = 8
    batch = 4
    embedding_dim = 64
    h_dim = 64

    key = jax.random.PRNGKey(0)
    k_x, k_p = jax.random.split(key)

    obs_traj = jax.random.normal(k_x, (obs_len, batch, 2), jnp.float32)
    params = make_params(k_p, embedding_dim, h_dim)

    final_h = jax.block_until_ready(encoder_forward(obs_traj, params))
    ref_h = jax.block_until_ready(encoder_reference(obs_traj, params))

    assert final_h.shape == (1, batch, h_dim), final_h.shape
    err = float(jnp.max(jnp.abs(final_h - ref_h)))
    assert err < 2e-4, err

    print("KERNEL_OK")
</pallas_src>

<mosaic_0001>
module attributes {stable_mosaic.version = 11 : i64} {
  func.func @encoder_kernel(%arg0: i32, %arg1: memref<8x8x2xf32, #tpu.memory_space<vmem>>, %arg2: memref<2x512xf32, #tpu.memory_space<vmem>>, %arg3: memref<1x512xf32, #tpu.memory_space<vmem>>, %arg4: memref<128x512xbf16, #tpu.memory_space<vmem>>, %arg5: memref<1x8x128xf32, #tpu.memory_space<vmem>>, %arg6: memref<8x8x512xf32, #tpu.memory_space<vmem>>) attributes {dimension_semantics = [#tpu.dimension_semantics<parallel>], iteration_bounds = array<i64: 1>, scalar_prefetch = 0 : i64, scratch_operands = 1 : i64, tpu.core_type = #tpu.core_type<tc>, window_params = [{transform_indices = @transform_0, window_bounds = array<i64: 8, 8, 2>}, {pipeline_mode = #tpu.pipeline_mode<synchronous>, transform_indices = @transform_1, window_bounds = array<i64: 2, 512>}, {pipeline_mode = #tpu.pipeline_mode<synchronous>, transform_indices = @transform_2, window_bounds = array<i64: 1, 512>}, {pipeline_mode = #tpu.pipeline_mode<synchronous>, transform_indices = @transform_3, window_bounds = array<i64: 128, 512>}, {transform_indices = @transform_4, window_bounds = array<i64: 1, 8, 128>}]} {
    %c0 = arith.constant 0 : index
    %c0_0 = arith.constant 0 : index
    %c0_1 = arith.constant 0 : index
    %0 = vector.load %arg1[%c0, %c0_0, %c0_1] : memref<8x8x2xf32, #tpu.memory_space<vmem>>, vector<8x8x2xf32>
    %c0_2 = arith.constant 0 : index
    %c0_3 = arith.constant 0 : index
    %1 = vector.load %arg2[%c0_2, %c0_3] : memref<2x512xf32, #tpu.memory_space<vmem>>, vector<2x512xf32>
    %2 = vector.extract_strided_slice %0 {offsets = [0, 0, 0], sizes = [8, 8, 1], strides = [1, 1, 1]} : vector<8x8x2xf32> to vector<8x8x1xf32>
    %3 = vector.extract_strided_slice %1 {offsets = [0, 0], sizes = [1, 512], strides = [1, 1]} : vector<2x512xf32> to vector<1x512xf32>
    %4 = vector.shape_cast %3 : vector<1x512xf32> to vector<1x1x512xf32>
    %5 = vector.broadcast %2 : vector<8x8x1xf32> to vector<8x8x512xf32>
    %6 = vector.broadcast %4 : vector<1x1x512xf32> to vector<8x8x512xf32>
    %7 = arith.mulf %5, %6 : vector<8x8x512xf32>
    %8 = vector.extract_strided_slice %0 {offsets = [0, 0, 1], sizes = [8, 8, 1], strides = [1, 1, 1]} : vector<8x8x2xf32> to vector<8x8x1xf32>
    %9 = vector.extract_strided_slice %1 {offsets = [1, 0], sizes = [1, 512], strides = [1, 1]} : vector<2x512xf32> to vector<1x512xf32>
    %10 = vector.shape_cast %9 : vector<1x512xf32> to vector<1x1x512xf32>
    %11 = vector.broadcast %8 : vector<8x8x1xf32> to vector<8x8x512xf32>
    %12 = vector.broadcast %10 : vector<1x1x512xf32> to vector<8x8x512xf32>
    %13 = arith.mulf %11, %12 : vector<8x8x512xf32>
    %14 = arith.addf %7, %13 : vector<8x8x512xf32>
    %c0_4 = arith.constant 0 : index
    %c0_5 = arith.constant 0 : index
    %15 = vector.load %arg3[%c0_4, %c0_5] : memref<1x512xf32, #tpu.memory_space<vmem>>, vector<1x512xf32>
    %16 = vector.shape_cast %15 : vector<1x512xf32> to vector<1x1x512xf32>
    %17 = vector.broadcast %16 : vector<1x1x512xf32> to vector<8x8x512xf32>
    %18 = arith.addf %14, %17 : vector<8x8x512xf32>
    %c0_6 = arith.constant 0 : index
    %c0_7 = arith.constant 0 : index
    %c0_8 = arith.constant 0 : index
    %19 = vector.load %arg6[%c0_6, %c0_7, %c0_8] : memref<8x8x512xf32, #tpu.memory_space<vmem>>, vector<8x8x512xf32>
    tpu.vector_store %arg6[%c0_6, %c0_7, %c0_8], %18 {strides = array<i32>} : memref<8x8x512xf32, #tpu.memory_space<vmem>>, vector<8x8x512xf32>,
    %cst = arith.constant 0.000000e+00 : f32
    %20 = vector.broadcast %cst : f32 to vector<8x128xf32>
    %cst_9 = arith.constant 0.000000e+00 : f32
    %21 = vector.broadcast %cst_9 : f32 to vector<8x128xf32>
    %c0_i32 = arith.constant 0 : i32
    %22 = arith.index_cast %c0_i32 : i32 to index
    %c0_10 = arith.constant 0 : index
    %c0_11 = arith.constant 0 : index
    %23 = vector.load %arg6[%22, %c0_10, %c0_11] : memref<8x8x512xf32, #tpu.memory_space<vmem>>, vector<1x8x512xf32>
    %24 = vector.shape_cast %23 : vector<1x8x512xf32> to vector<8x512xf32>
    %25 = arith.truncf %20 : vector<8x128xf32> to vector<8x128xbf16>
    %c0_12 = arith.constant 0 : index
    %c0_13 = arith.constant 0 : index
    %26 = vector.load %arg4[%c0_12, %c0_13] : memref<128x512xbf16, #tpu.memory_space<vmem>>, vector<128x512xbf16>
    %cst_14 = arith.constant dense<0.000000e+00> : vector<8x512xf32>
    %27 = tpu.matmul %25, %26, %cst_14 {dimension_numbers = #tpu.dot_dimension_numbers<[1], [0], [0], [1], [0, 0, 1, 1], [], []>} : vector<8x128xbf16>, vector<128x512xbf16>, vector<8x512xf32> -> vector<8x512xf32>
    %28 = arith.addf %24, %27 : vector<8x512xf32>
    %29 = vector.extract_strided_slice %28 {offsets = [0, 0], sizes = [8, 384], strides = [1, 1]} : vector<8x512xf32> to vector<8x384xf32>
    %30 = arith.negf %29 : vector<8x384xf32>
    %31 = math.exp %30 : vector<8x384xf32>
    %cst_15 = arith.constant 1.000000e+00 : f32
    %32 = vector.broadcast %cst_15 : f32 to vector<8x384xf32>
    %33 = arith.addf %32, %31 : vector<8x384xf32>
    %34 = arith.divf %32, %33 : vector<8x384xf32>
    %35 = vector.extract_strided_slice %34 {offsets = [0, 0], sizes = [8, 128], strides = [1, 1]} : vector<8x384xf32> to vector<8x128xf32>
    %36 = vector.extract_strided_slice %34 {offsets = [0, 128], sizes = [8, 128], strides = [1, 1]} : vector<8x384xf32> to vector<8x128xf32>
    %37 = vector.extract_strided_slice %34 {offsets = [0, 256], sizes = [8, 128], strides = [1, 1]} : vector<8x384xf32> to vector<8x128xf32>
    %38 = vector.extract_strided_slice %28 {offsets = [0, 384], sizes = [8, 128], strides = [1, 1]} : vector<8x512xf32> to vector<8x128xf32>
    %39 = math.tanh %38 : vector<8x128xf32>
    %40 = arith.mulf %36, %21 : vector<8x128xf32>
    %41 = arith.mulf %35, %39 : vector<8x128xf32>
    %42 = arith.addf %40, %41 : vector<8x128xf32>
    %43 = math.tanh %42 : vector<8x128xf32>
    %44 = arith.mulf %37, %43 : vector<8x128xf32>
    %c1_i32 = arith.constant 1 : i32
    %45 = arith.index_cast %c1_i32 : i32 to index
    %c0_16 = arith.constant 0 : index
    %c0_17 = arith.constant 0 : index
    %46 = vector.load %arg6[%45, %c0_16, %c0_17] : memref<8x8x512xf32, #tpu.memory_space<vmem>>, vector<1x8x512xf32>
    %47 = vector.shape_cast %46 : vector<1x8x512xf32> to vector<8x512xf32>
    %48 = arith.truncf %44 : vector<8x128xf32> to vector<8x128xbf16>
    %c0_18 = arith.constant 0 : index
    %c0_19 = arith.constant 0 : index
    %49 = vector.load %arg4[%c0_18, %c0_19] : memref<128x512xbf16, #tpu.memory_space<vmem>>, vector<128x512xbf16>
    %cst_20 = arith.constant dense<0.000000e+00> : vector<8x512xf32>
    %50 = tpu.matmul %48, %49, %cst_20 {dimension_numbers = #tpu.dot_dimension_numbers<[1], [0], [0], [1], [0, 0, 1, 1], [], []>} : vector<8x128xbf16>, vector<128x512xbf16>, vector<8x512xf32> -> vector<8x512xf32>
    %51 = arith.addf %47, %50 : vector<8x512xf32>
    %52 = vector.extract_strided_slice %51 {offsets = [0, 0], sizes = [8, 384], strides = [1, 1]} : vector<8x512xf32> to vector<8x384xf32>
    %53 = arith.negf %52 : vector<8x384xf32>
    %54 = math.exp %53 : vector<8x384xf32>
    %cst_21 = arith.constant 1.000000e+00 : f32
    %55 = vector.broadcast %cst_21 : f32 to vector<8x384xf32>
    %56 = arith.addf %55, %54 : vector<8x384xf32>
    %57 = arith.divf %55, %56 : vector<8x384xf32>
    %58 = vector.extract_strided_slice %57 {offsets = [0, 0], sizes = [8, 128], strides = [1, 1]} : vector<8x384xf32> to vector<8x128xf32>
    %59 = vector.extract_strided_slice %57 {offsets = [0, 128], sizes = [8, 128], strides = [1, 1]} : vector<8x384xf32> to vector<8x128xf32>
    %60 = vector.extract_strided_slice %57 {offsets = [0, 256], sizes = [8, 128], strides = [1, 1]} : vector<8x384xf32> to vector<8x128xf32>
    %61 = vector.extract_strided_slice %51 {offsets = [0, 384], sizes = [8, 128], strides = [1, 1]} : vector<8x512xf32> to vector<8x128xf32>
    %62 = math.tanh %61 : vector<8x128xf32>
    %63 = arith.mulf %59, %42 : vector<8x128xf32>
    %64 = arith.mulf %58, %62 : vector<8x128xf32>
    %65 = arith.addf %63, %64 : vector<8x128xf32>
    %66 = math.tanh %65 : vector<8x128xf32>
    %67 = arith.mulf %60, %66 : vector<8x128xf32>
    %c2_i32 = arith.constant 2 : i32
    %68 = arith.index_cast %c2_i32 : i32 to index
    %c0_22 = arith.constant 0 : index
    %c0_23 = arith.constant 0 : index
    %69 = vector.load %arg6[%68, %c0_22, %c0_23] : memref<8x8x512xf32, #tpu.memory_space<vmem>>, vector<1x8x512xf32>
    %70 = vector.shape_cast %69 : vector<1x8x512xf32> to vector<8x512xf32>
    %71 = arith.truncf %67 : vector<8x128xf32> to vector<8x128xbf16>
    %c0_24 = arith.constant 0 : index
    %c0_25 = arith.constant 0 : index
    %72 = vector.load %arg4[%c0_24, %c0_25] : memref<128x512xbf16, #tpu.memory_space<vmem>>, vector<128x512xbf16>
    %cst_26 = arith.constant dense<0.000000e+00> : vector<8x512xf32>
    %73 = tpu.matmul %71, %72, %cst_26 {dimension_numbers = #tpu.dot_dimension_numbers<[1], [0], [0], [1], [0, 0, 1, 1], [], []>} : vector<8x128xbf16>, vector<128x512xbf16>, vector<8x512xf32> -> vector<8x512xf32>
    %74 = arith.addf %70, %73 : vector<8x512xf32>
    %75 = vector.extract_strided_slice %74 {offsets = [0, 0], sizes = [8, 384], strides = [1, 1]} : vector<8x512xf32> to vector<8x384xf32>
    %76 = arith.negf %75 : vector<8x384xf32>
    %77 = math.exp %76 : vector<8x384xf32>
    %cst_27 = arith.constant 1.000000e+00 : f32
    %78 = vector.broadcast %cst_27 : f32 to vector<8x384xf32>
    %79 = arith.addf %78, %77 : vector<8x384xf32>
    %80 = arith.divf %78, %79 : vector<8x384xf32>
    %81 = vector.extract_strided_slice %80 {offsets = [0, 0], sizes = [8, 128], strides = [1, 1]} : vector<8x384xf32> to vector<8x128xf32>
    %82 = vector.extract_strided_slice %80 {offsets = [0, 128], sizes = [8, 128], strides = [1, 1]} : vector<8x384xf32> to vector<8x128xf32>
    %83 = vector.extract_strided_slice %80 {offsets = [0, 256], sizes = [8, 128], strides = [1, 1]} : vector<8x384xf32> to vector<8x128xf32>
    %84 = vector.extract_strided_slice %74 {offsets = [0, 384], sizes = [8, 128], strides = [1, 1]} : vector<8x512xf32> to vector<8x128xf32>
    %85 = math.tanh %84 : vector<8x128xf32>
    %86 = arith.mulf %82, %65 : vector<8x128xf32>
    %87 = arith.mulf %81, %85 : vector<8x128xf32>
    %88 = arith.addf %86, %87 : vector<8x128xf32>
    %89 = math.tanh %88 : vector<8x128xf32>
    %90 = arith.mulf %83, %89 : vector<8x128xf32>
    %c3_i32 = arith.constant 3 : i32
    %91 = arith.index_cast %c3_i32 : i32 to index
    %c0_28 = arith.constant 0 : index
    %c0_29 = arith.constant 0 : index
    %92 = vector.load %arg6[%91, %c0_28, %c0_29] : memref<8x8x512xf32, #tpu.memory_space<vmem>>, vector<1x8x512xf32>
    %93 = vector.shape_cast %92 : vector<1x8x512xf32> to vector<8x512xf32>
    %94 = arith.truncf %90 : vector<8x128xf32> to vector<8x128xbf16>
    %c0_30 = arith.constant 0 : index
    %c0_31 = arith.constant 0 : index
    %95 = vector.load %arg4[%c0_30, %c0_31] : memref<128x512xbf16, #tpu.memory_space<vmem>>, vector<128x512xbf16>
    %cst_32 = arith.constant dense<0.000000e+00> : vector<8x512xf32>
    %96 = tpu.matmul %94, %95, %cst_32 {dimension_numbers = #tpu.dot_dimension_numbers<[1], [0], [0], [1], [0, 0, 1, 1], [], []>} : vector<8x128xbf16>, vector<128x512xbf16>, vector<8x512xf32> -> vector<8x512xf32>
    %97 = arith.addf %93, %96 : vector<8x512xf32>
    %98 = vector.extract_strided_slice %97 {offsets = [0, 0], sizes = [8, 384], strides = [1, 1]} : vector<8x512xf32> to vector<8x384xf32>
    %99 = arith.negf %98 : vector<8x384xf32>
    %100 = math.exp %99 : vector<8x384xf32>
    %cst_33 = arith.constant 1.000000e+00 : f32
    %101 = vector.broadcast %cst_33 : f32 to vector<8x384xf32>
    %102 = arith.addf %101, %100 : vector<8x384xf32>
    %103 = arith.divf %101, %102 : vector<8x384xf32>
    %104 = vector.extract_strided_slice %103 {offsets = [0, 0], sizes = [8, 128], strides = [1, 1]} : vector<8x384xf32> to vector<8x128xf32>
    %105 = vector.extract_strided_slice %103 {offsets = [0, 128], sizes = [8, 128], strides = [1, 1]} : vector<8x384xf32> to vector<8x128xf32>
    %106 = vector.extract_strided_slice %103 {offsets = [0, 256], sizes = [8, 128], strides = [1, 1]} : vector<8x384xf32> to vector<8x128xf32>
    %107 = vector.extract_strided_slice %97 {offsets = [0, 384], sizes = [8, 128], strides = [1, 1]} : vector<8x512xf32> to vector<8x128xf32>
    %108 = math.tanh %107 : vector<8x128xf32>
    %109 = arith.mulf %105, %88 : vector<8x128xf32>
    %110 = arith.mulf %104, %108 : vector<8x128xf32>
    %111 = arith.addf %109, %110 : vector<8x128xf32>
    %112 = math.tanh %111 : vector<8x128xf32>
    %113 = arith.mulf %106, %112 : vector<8x128xf32>
    %c4_i32 = arith.constant 4 : i32
    %114 = arith.index_cast %c4_i32 : i32 to index
    %c0_34 = arith.constant 0 : index
    %c0_35 = arith.constant 0 : index
    %115 = vector.load %arg6[%114, %c0_34, %c0_35] : memref<8x8x512xf32, #tpu.memory_space<vmem>>, vector<1x8x512xf32>
    %116 = vector.shape_cast %115 : vector<1x8x512xf32> to vector<8x512xf32>
    %117 = arith.truncf %113 : vector<8x128xf32> to vector<8x128xbf16>
    %c0_36 = arith.constant 0 : index
    %c0_37 = arith.constant 0 : index
    %118 = vector.load %arg4[%c0_36, %c0_37] : memref<128x512xbf16, #tpu.memory_space<vmem>>, vector<128x512xbf16>
    %cst_38 = arith.constant dense<0.000000e+00> : vector<8x512xf32>
    %119 = tpu.matmul %117, %118, %cst_38 {dimension_numbers = #tpu.dot_dimension_numbers<[1], [0], [0], [1], [0, 0, 1, 1], [], []>} : vector<8x128xbf16>, vector<128x512xbf16>, vector<8x512xf32> -> vector<8x512xf32>
    %120 = arith.addf %116, %119 : vector<8x512xf32>
    %121 = vector.extract_strided_slice %120 {offsets = [0, 0], sizes = [8, 384], strides = [1, 1]} : vector<8x512xf32> to vector<8x384xf32>
    %122 = arith.negf %121 : vector<8x384xf32>
    %123 = math.exp %122 : vector<8x384xf32>
    %cst_39 = arith.constant 1.000000e+00 : f32
    %124 = vector.broadcast %cst_39 : f32 to vector<8x384xf32>
    %125 = arith.addf %124, %123 : vector<8x384xf32>
    %126 = arith.divf %124, %125 : vector<8x384xf32>
    %127 = vector.extract_strided_slice %126 {offsets = [0, 0], sizes = [8, 128], strides = [1, 1]} : vector<8x384xf32> to vector<8x128xf32>
    %128 = vector.extract_strided_slice %126 {offsets = [0, 128], sizes = [8, 128], strides = [1, 1]} : vector<8x384xf32> to vector<8x128xf32>
    %129 = vector.extract_strided_slice %126 {offsets = [0, 256], sizes = [8, 128], strides = [1, 1]} : vector<8x384xf32> to vector<8x128xf32>
    %130 = vector.extract_strided_slice %120 {offsets = [0, 384], sizes = [8, 128], strides = [1, 1]} : vector<8x512xf32> to vector<8x128xf32>
    %131 = math.tanh %130 : vector<8x128xf32>
    %132 = arith.mulf %128, %111 : vector<8x128xf32>
    %133 = arith.mulf %127, %131 : vector<8x128xf32>
    %134 = arith.addf %132, %133 : vector<8x128xf32>
    %135 = math.tanh %134 : vector<8x128xf32>
    %136 = arith.mulf %129, %135 : vector<8x128xf32>
    %c5_i32 = arith.constant 5 : i32
    %137 = arith.index_cast %c5_i32 : i32 to index
    %c0_40 = arith.constant 0 : index
    %c0_41 = arith.constant 0 : index
    %138 = vector.load %arg6[%137, %c0_40, %c0_41] : memref<8x8x512xf32, #tpu.memory_space<vmem>>, vector<1x8x512xf32>
    %139 = vector.shape_cast %138 : vector<1x8x512xf32> to vector<8x512xf32>
    %140 = arith.truncf %136 : vector<8x128xf32> to vector<8x128xbf16>
    %c0_42 = arith.constant 0 : index
    %c0_43 = arith.constant 0 : index
    %141 = vector.load %arg4[%c0_42, %c0_43] : memref<128x512xbf16, #tpu.memory_space<vmem>>, vector<128x512xbf16>
    %cst_44 = arith.constant dense<0.000000e+00> : vector<8x512xf32>
    %142 = tpu.matmul %140, %141, %cst_44 {dimension_numbers = #tpu.dot_dimension_numbers<[1], [0], [0], [1], [0, 0, 1, 1], [], []>} : vector<8x128xbf16>, vector<128x512xbf16>, vector<8x512xf32> -> vector<8x512xf32>
    %143 = arith.addf %139, %142 : vector<8x512xf32>
    %144 = vector.extract_strided_slice %143 {offsets = [0, 0], sizes = [8, 384], strides = [1, 1]} : vector<8x512xf32> to vector<8x384xf32>
    %145 = arith.negf %144 : vector<8x384xf32>
    %146 = math.exp %145 : vector<8x384xf32>
    %cst_45 = arith.constant 1.000000e+00 : f32
    %147 = vector.broadcast %cst_45 : f32 to vector<8x384xf32>
    %148 = arith.addf %147, %146 : vector<8x384xf32>
    %149 = arith.divf %147, %148 : vector<8x384xf32>
    %150 = vector.extract_strided_slice %149 {offsets = [0, 0], sizes = [8, 128], strides = [1, 1]} : vector<8x384xf32> to vector<8x128xf32>
    %151 = vector.extract_strided_slice %149 {offsets = [0, 128], sizes = [8, 128], strides = [1, 1]} : vector<8x384xf32> to vector<8x128xf32>
    %152 = vector.extract_strided_slice %149 {offsets = [0, 256], sizes = [8, 128], strides = [1, 1]} : vector<8x384xf32> to vector<8x128xf32>
    %153 = vector.extract_strided_slice %143 {offsets = [0, 384], sizes = [8, 128], strides = [1, 1]} : vector<8x512xf32> to vector<8x128xf32>
    %154 = math.tanh %153 : vector<8x128xf32>
    %155 = arith.mulf %151, %134 : vector<8x128xf32>
    %156 = arith.mulf %150, %154 : vector<8x128xf32>
    %157 = arith.addf %155, %156 : vector<8x128xf32>
    %158 = math.tanh %157 : vector<8x128xf32>
    %159 = arith.mulf %152, %158 : vector<8x128xf32>
    %c6_i32 = arith.constant 6 : i32
    %160 = arith.index_cast %c6_i32 : i32 to index
    %c0_46 = arith.constant 0 : index
    %c0_47 = arith.constant 0 : index
    %161 = vector.load %arg6[%160, %c0_46, %c0_47] : memref<8x8x512xf32, #tpu.memory_space<vmem>>, vector<1x8x512xf32>
    %162 = vector.shape_cast %161 : vector<1x8x512xf32> to vector<8x512xf32>
    %163 = arith.truncf %159 : vector<8x128xf32> to vector<8x128xbf16>
    %c0_48 = arith.constant 0 : index
    %c0_49 = arith.constant 0 : index
    %164 = vector.load %arg4[%c0_48, %c0_49] : memref<128x512xbf16, #tpu.memory_space<vmem>>, vector<128x512xbf16>
    %cst_50 = arith.constant dense<0.000000e+00> : vector<8x512xf32>
    %165 = tpu.matmul %163, %164, %cst_50 {dimension_numbers = #tpu.dot_dimension_numbers<[1], [0], [0], [1], [0, 0, 1, 1], [], []>} : vector<8x128xbf16>, vector<128x512xbf16>, vector<8x512xf32> -> vector<8x512xf32>
    %166 = arith.addf %162, %165 : vector<8x512xf32>
    %167 = vector.extract_strided_slice %166 {offsets = [0, 0], sizes = [8, 384], strides = [1, 1]} : vector<8x512xf32> to vector<8x384xf32>
    %168 = arith.negf %167 : vector<8x384xf32>
    %169 = math.exp %168 : vector<8x384xf32>
    %cst_51 = arith.constant 1.000000e+00 : f32
    %170 = vector.broadcast %cst_51 : f32 to vector<8x384xf32>
    %171 = arith.addf %170, %169 : vector<8x384xf32>
    %172 = arith.divf %170, %171 : vector<8x384xf32>
    %173 = vector.extract_strided_slice %172 {offsets = [0, 0], sizes = [8, 128], strides = [1, 1]} : vector<8x384xf32> to vector<8x128xf32>
    %174 = vector.extract_strided_slice %172 {offsets = [0, 128], sizes = [8, 128], strides = [1, 1]} : vector<8x384xf32> to vector<8x128xf32>
    %175 = vector.extract_strided_slice %172 {offsets = [0, 256], sizes = [8, 128], strides = [1, 1]} : vector<8x384xf32> to vector<8x128xf32>
    %176 = vector.extract_strided_slice %166 {offsets = [0, 384], sizes = [8, 128], strides = [1, 1]} : vector<8x512xf32> to vector<8x128xf32>
    %177 = math.tanh %176 : vector<8x128xf32>
    %178 = arith.mulf %174, %157 : vector<8x128xf32>
    %179 = arith.mulf %173, %177 : vector<8x128xf32>
    %180 = arith.addf %178, %179 : vector<8x128xf32>
    %181 = math.tanh %180 : vector<8x128xf32>
    %182 = arith.mulf %175, %181 : vector<8x128xf32>
    %c7_i32 = arith.constant 7 : i32
    %183 = arith.index_cast %c7_i32 : i32 to index
    %c0_52 = arith.constant 0 : index
    %c0_53 = arith.constant 0 : index
    %184 = vector.load %arg6[%183, %c0_52, %c0_53] : memref<8x8x512xf32, #tpu.memory_space<vmem>>, vector<1x8x512xf32>
    %185 = vector.shape_cast %184 : vector<1x8x512xf32> to vector<8x512xf32>
    %186 = arith.truncf %182 : vector<8x128xf32> to vector<8x128xbf16>
    %c0_54 = arith.constant 0 : index
    %c0_55 = arith.constant 0 : index
    %187 = vector.load %arg4[%c0_54, %c0_55] : memref<128x512xbf16, #tpu.memory_space<vmem>>, vector<128x512xbf16>
    %cst_56 = arith.constant dense<0.000000e+00> : vector<8x512xf32>
    %188 = tpu.matmul %186, %187, %cst_56 {dimension_numbers = #tpu.dot_dimension_numbers<[1], [0], [0], [1], [0, 0, 1, 1], [], []>} : vector<8x128xbf16>, vector<128x512xbf16>, vector<8x512xf32> -> vector<8x512xf32>
    %189 = arith.addf %185, %188 : vector<8x512xf32>
    %190 = vector.extract_strided_slice %189 {offsets = [0, 0], sizes = [8, 384], strides = [1, 1]} : vector<8x512xf32> to vector<8x384xf32>
    %191 = arith.negf %190 : vector<8x384xf32>
    %192 = math.exp %191 : vector<8x384xf32>
    %cst_57 = arith.constant 1.000000e+00 : f32
    %193 = vector.broadcast %cst_57 : f32 to vector<8x384xf32>
    %194 = arith.addf %193, %192 : vector<8x384xf32>
    %195 = arith.divf %193, %194 : vector<8x384xf32>
    %196 = vector.extract_strided_slice %195 {offsets = [0, 0], sizes = [8, 128], strides = [1, 1]} : vector<8x384xf32> to vector<8x128xf32>
    %197 = vector.extract_strided_slice %195 {offsets = [0, 128], sizes = [8, 128], strides = [1, 1]} : vector<8x384xf32> to vector<8x128xf32>
    %198 = vector.extract_strided_slice %195 {offsets = [0, 256], sizes = [8, 128], strides = [1, 1]} : vector<8x384xf32> to vector<8x128xf32>
    %199 = vector.extract_strided_slice %189 {offsets = [0, 384], sizes = [8, 128], strides = [1, 1]} : vector<8x512xf32> to vector<8x128xf32>
    %200 = math.tanh %199 : vector<8x128xf32>
    %201 = arith.mulf %197, %180 : vector<8x128xf32>
    %202 = arith.mulf %196, %200 : vector<8x128xf32>
    %203 = arith.addf %201, %202 : vector<8x128xf32>
    %204 = math.tanh %203 : vector<8x128xf32>
    %205 = arith.mulf %198, %204 : vector<8x128xf32>
    %c8_i32 = arith.constant 8 : i32
    %c0_58 = arith.constant 0 : index
    %c0_59 = arith.constant 0 : index
    %c0_60 = arith.constant 0 : index
    %206 = vector.load %arg5[%c0_58, %c0_59, %c0_60] : memref<1x8x128xf32, #tpu.memory_space<vmem>>, vector<1x8x128xf32>
    %207 = vector.shape_cast %206 : vector<1x8x128xf32> to vector<8x128xf32>
    %208 = vector.shape_cast %205 : vector<8x128xf32> to vector<1x8x128xf32>
    tpu.vector_store %arg5[%c0_58, %c0_59, %c0_60], %208 {strides = array<i32>} : memref<1x8x128xf32, #tpu.memory_space<vmem>>, vector<1x8x128xf32>,
    return
  }
  func.func @transform_0(%arg0: i32) -> (i32, i32, i32) {
    %c0_i32 = arith.constant 0 : i32
    %c0_i32_0 = arith.constant 0 : i32
    %c0_i32_1 = arith.constant 0 : i32
    return %c0_i32, %arg0, %c0_i32_0 : i32, i32, i32
  }
  func.func @transform_1(%arg0: i32) -> (i32, i32) {
    %c0_i32 = arith.constant 0 : i32
    %c0_i32_0 = arith.constant 0 : i32
    %c0_i32_1 = arith.constant 0 : i32
    return %c0_i32, %c0_i32_0 : i32, i32
  }
  func.func @transform_2(%arg0: i32) -> (i32, i32) {
    %c0_i32 = arith.constant 0 : i32
    %c0_i32_0 = arith.constant 0 : i32
    %c0_i32_1 = arith.constant 0 : i32
    return %c0_i32, %c0_i32_0 : i32, i32
  }
  func.func @transform_3(%arg0: i32) -> (i32, i32) {
    %c0_i32 = arith.constant 0 : i32
    %c0_i32_0 = arith.constant 0 : i32
    %c0_i32_1 = arith.constant 0 : i32
    return %c0_i32, %c0_i32_0 : i32, i32
  }
  func.func @transform_4(%arg0: i32) -> (i32, i32, i32) {
    %c0_i32 = arith.constant 0 : i32
    %c0_i32_0 = arith.constant 0 : i32
    %c0_i32_1 = arith.constant 0 : i32
    return %c0_i32, %arg0, %c0_i32_0 : i32, i32, i32
  }
}

</mosaic_0001>

<bundles_post_ra>
// kernel: tpu_custom_call.1
= control target key start
LH: loop header
LB: loop body
LE: loop exit
PB: predicated region body
PF: predicated region fallthrough
CT: control target
= control target key end

     0   :  { %9 = vsyncpa [#allocation4], 0  ;;  %s2591_s0 = inlined_call_operand.vmem [shape: f32[8,8,2], index: 0, kind: input, shape index: {}]   ;;  %s2592_s1 = inlined_call_operand.vmem [shape: f32[2,512], index: 1, kind: input, shape index: {}]   ;;  %s2593_s2 = inlined_call_operand.vmem [shape: f32[1,512], index: 2, kind: input, shape index: {}]   ;;  %s2594_s3 = inlined_call_operand.hbm [shape: bf16[128,512], index: 3, kind: input, shape index: {}]   ;;  %s2595_s4 = inlined_call_operand.hbm [shape: f32[1,8,128], index: 4, kind: output, shape index: {}]  }
   0x1   :  { %10 = vsyncpa [#allocation5], 0  ;;  %s1826_s15 = smov [#allocation3]   ;;  %s1778_s19 = scalar_lea.hbm %s2594_s3, 4096 }
   0x2   :  { %s22_s16 = sshll.u32 %s1826_s15, 4  ;;  %p1779_p0 = scmp.ne.s32.totalorder %s2594_s3, %s1778_s19  ;;  %s23_s16 = int_to_ptr.vmem [resolvable:$true] %s22_s16 }
   0x3   :  { %p1782_p1 = scmp.lt.u32.totalorder %s1778_s19, %s2594_s3 }
   0x5   :  { %p1784_p2 = pnand %p1782_p1, %p1779_p0 }
   0x7   :  { %1787 = shalt.err (!%p1784_p2)
}
   0x8   :  { %s1788_s24 = scalar_lea.vmem %s23_s16, 4096  ;;  %p1793_p4 = scmp.lt.s32.totalorder %s23_s16, %s23_s16 }
   0x9   :  { %p1789_p3 = scmp.ne.s32.totalorder %s23_s16, %s1788_s24  ;;  %p1794_p5 = scmp.lt.s32.totalorder %s1788_s24, %s1788_s24 }
   0xb   :  { %p1795_p6 = por %p1794_p5, %p1793_p4 }
   0xd   :  { %p1796_p7 = pnand %p1795_p6, %p1789_p3 }
   0xf   :  { %1799 = shalt.err (!%p1796_p7)
}
  0x10   :  { %s1827_s25 = smov 256   ;;  %s1828_s26 = smov 16  }
  0x11   :  { %28 = dma.hbm_to_vmem [thread:$0]  %s2594_s3, 4096, %s23_s16, [#allocation4], %s1827_s25, %s1827_s25, %s1828_s26  }
  0x12   :  { %1822 = dma.done.wait [#allocation4], 4096  }
  0x13   :  { %1823 = vsyncadd [#allocation4], 4294963200  ;;  %v2596_v0 = vmov 0   ;;  %v1873_v1 = vld [vmem:[#allocation3 + $0x4] ss:$16 sps:$4 sm:$0xff]   ;;  %v34_v27 = vld [vmem:[%s2591_s0 + $0x8] sm:$0xff]  ;;  %v83_v42 = vlaneseq }
  0x14   :  { %597 = vmatprep.mubr.bf16.mxu0 %v2596_v0  ;;  %638 = vmatprep.mubr.bf16.mxu1 %v2596_v0  ;;  %2614 = vst [vmem:[#allocation9_spill] sm:$0xff] %v1873_v1  ;;  %v1875_v2 = vld [vmem:[#allocation3 + $0xc] ss:$16 sps:$4 sm:$0xff]   ;;  %v1878_v3 = vld [vmem:[#allocation3] ss:$16 sps:$4 sm:$0xff]   ;;  %v1830_v33 = vmov 1  }
  0x15   :  { %1567 = vset.pattern.permute.xlu1 %v2596_v0  ;;  %1565 = vset.pattern.permute.xlu0 %v2596_v0  ;;  %2615 = vst [vmem:[#allocation10_spill] sm:$0xff] %v1875_v2  ;;  %v1880_v4 = vld [vmem:[#allocation3 + $0x8] ss:$16 sps:$4 sm:$0xff]   ;;  %v1883_v5 = vld [vmem:[#allocation3 + $0x24] ss:$16 sps:$4 sm:$0xff]   ;;  %v2032_v43 = vshrl.u32 %v83_v42, 7 }
  0x16   :  { %565 = vmatprep.subr.bf16.mxu0 %v1873_v1  ;;  %606 = vmatprep.subr.bf16.mxu1 %v1875_v2  ;;  %v1887_v6 = vld [vmem:[#allocation3 + $0x2c] ss:$16 sps:$4 sm:$0xff]   ;;  %v1889_v7 = vld [vmem:[#allocation3 + $0x20] ss:$16 sps:$4 sm:$0xff]   ;;  %v1892_v8 = vld [vmem:[#allocation3 + $0x28] ss:$16 sps:$4 sm:$0xff]  }
  0x17   :  { %566 = vmatpush1.bf16.msra.mxu0 %v1878_v3  ;;  %607 = vmatpush1.bf16.msra.mxu1 %v1880_v4  ;;  %v1895_v9 = vld [vmem:[#allocation3 + $0x44] ss:$16 sps:$4 sm:$0xff]   ;;  %v1897_v10 = vld [vmem:[#allocation3 + $0x4c] ss:$16 sps:$4 sm:$0xff]   ;;  %v1899_v11 = vld [vmem:[#allocation3 + $0x40] ss:$16 sps:$4 sm:$0xff]  }
  0x18   :  { %567 = vmatprep.subr.bf16.mxu0 %v1883_v5  ;;  %608 = vmatprep.subr.bf16.mxu1 %v1887_v6  ;;  %v1901_v12 = vld [vmem:[#allocation3 + $0x48] ss:$16 sps:$4 sm:$0xff]   ;;  %v1905_v13 = vld [vmem:[#allocation3 + $0x64] ss:$16 sps:$4 sm:$0xff]   ;;  %v1909_v14 = vld [vmem:[#allocation3 + $0x6c] ss:$16 sps:$4 sm:$0xff]  }
  0x19   :  { %v1911_v15 = vld [vmem:[#allocation3 + $0x60] ss:$16 sps:$4 sm:$0xff]   ;;  %v1915_v16 = vld [vmem:[#allocation3 + $0x68] ss:$16 sps:$4 sm:$0xff]   ;;  %v1917_v17 = vld [vmem:[#allocation3 + $0x84] ss:$16 sps:$4 sm:$0xff]   ;;  %49 = vperm.xlu1 %1567, %v34_v27  }
  0x1a   :  { %v1921_v18 = vld [vmem:[#allocation3 + $0x8c] ss:$16 sps:$4 sm:$0xff]   ;;  %v1923_v19 = vld [vmem:[#allocation3 + $0x80] ss:$16 sps:$4 sm:$0xff]   ;;  %v1925_v20 = vld [vmem:[#allocation3 + $0x88] ss:$16 sps:$4 sm:$0xff]  }
  0x1b   :  { %568 = vmatpush1.bf16.msra.mxu0 %v1889_v7  ;;  %609 = vmatpush1.bf16.msra.mxu1 %v1892_v8  ;;  %v1929_v21 = vld [vmem:[#allocation3 + $0xa4] ss:$16 sps:$4 sm:$0xff]   ;;  %v1933_v22 = vld [vmem:[#allocation3 + $0xac] ss:$16 sps:$4 sm:$0xff]   ;;  %v1935_v23 = vld [vmem:[#allocation3 + $0xa0] ss:$16 sps:$4 sm:$0xff]  }
  0x1c   :  { %569 = vmatprep.subr.bf16.mxu0 %v1895_v9  ;;  %610 = vmatprep.subr.bf16.mxu1 %v1897_v10  ;;  %v1939_v24 = vld [vmem:[#allocation3 + $0xa8] ss:$16 sps:$4 sm:$0xff]   ;;  %v1941_v25 = vld [vmem:[#allocation3 + $0xc4] ss:$16 sps:$4 sm:$0xff]   ;;  %v1945_v26 = vld [vmem:[#allocation3 + $0xcc] ss:$16 sps:$4 sm:$0xff]  }
  0x1d   :  { %v33_v28 = vld [vmem:[%s2591_s0] sm:$0xff]  ;;  %v1957_v30 = vld [vmem:[#allocation3 + $0xc8] ss:$16 sps:$4 sm:$0xff]   ;;  %v1963_v32 = vld [vmem:[#allocation3 + $0xec] ss:$16 sps:$4 sm:$0xff]   ;;  %1568 = vset.pattern.permute.xlu1 %v1830_v33  ;;  %v2039_v46 = vsub.s32 1, %v2032_v43 }
  0x1e   :  { %44 = vperm.xlu0 %1565, %v33_v28   ;;  %v1955_v29 = vld [vmem:[#allocation3 + $0xc0] ss:$16 sps:$4 sm:$0xff]   ;;  %v1961_v31 = vld [vmem:[#allocation3 + $0xe4] ss:$16 sps:$4 sm:$0xff]   ;;  %2616 = vst [vmem:[#allocation11_spill] sm:$0xff] %v1963_v32  ;;  %156 = vperm.xlu1 %1568, %v34_v27   ;;  %v36_v37 = vld [vmem:[%s2591_s0 + $0x18] sm:$0xff] }
  0x1f   :  { %570 = vmatpush1.bf16.msra.mxu0 %v1899_v11  ;;  %611 = vmatpush1.bf16.msra.mxu1 %v1901_v12  ;;  %v1967_v34 = vld [vmem:[#allocation3 + $0xe0] ss:$16 sps:$4 sm:$0xff]   ;;  %v1969_v35 = vld [vmem:[#allocation3 + $0xe8] ss:$16 sps:$4 sm:$0xff]   ;;  %v2598_v47 = vsub.s32 3, %v2032_v43  ;;  %v193_v48 = vsub.s32 5, %v2032_v43 }
  0x20   :  { %571 = vmatprep.subr.bf16.mxu0 %v1905_v13  ;;  %612 = vmatprep.subr.bf16.mxu1 %v1909_v14  ;;  %2617 = vst [vmem:[#allocation12_spill] sm:$0xff] %v1967_v34  ;;  %2618 = vst [vmem:[#allocation13_spill] sm:$0xff] %v1969_v35  ;;  %v35_v36 = vld [vmem:[%s2591_s0 + $0x10] sm:$0xff]  ;;  %v37_v38 = vld [vmem:[%s2591_s0 + $0x20] sm:$0xff]  ;;  %v197_v49 = vsub.s32 7, %v2032_v43  ;;  %v85_v51 = vsub.s32 0, %v2032_v43 }
  0x21   :  { %v38_v39 = vld [vmem:[%s2591_s0 + $0x28] sm:$0xff]  ;;  %v39_v40 = vld [vmem:[%s2591_s0 + $0x30] sm:$0xff]  ;;  %v40_v41 = vld [vmem:[%s2591_s0 + $0x38] sm:$0xff]  ;;  %v2599_v52 = vsub.s32 2, %v2032_v43  ;;  %v93_v53 = vsub.s32 4, %v2032_v43  ;;  %v97_v54 = vsub.s32 6, %v2032_v43 }
  0x22   :  { %1566 = vset.pattern.permute.xlu0 %v1830_v33  ;;  %1569 = vset.pattern.permute.xlu1 %v2596_v0  ;;  %v41_v50 = vld [vmem:[%s2592_s1] sm:$0xff] }
  0x23   :  { %572 = vmatpush1.bf16.msra.mxu0 %v1911_v15  ;;  %613 = vmatpush1.bf16.msra.mxu1 %v1915_v16  ;;  %v186_v55 = vrot.slane %v41_v50, %v2039_v46  ;;  %v190_v56 = vrot.slane %v41_v50, %v2598_v47  ;;  %v194_v57 = vrot.slane %v41_v50, %v193_v48 }
  0x24   :  { %573 = vmatprep.subr.bf16.mxu0 %v1917_v17  ;;  %614 = vmatprep.subr.bf16.mxu1 %v1921_v18  ;;  %v198_v58 = vrot.slane %v41_v50, %v197_v49  ;;  %v86_v59 = vrot.slane %v41_v50, %v85_v51  ;;  %v90_v60 = vrot.slane %v41_v50, %v2599_v52 }
  0x25   :  { %152 = vperm.xlu0 %1566, %v33_v28   ;;  %54 = vperm.xlu1 %1569, %v35_v36   ;;  %v94_v61 = vrot.slane %v41_v50, %v93_v53  ;;  %v98_v62 = vrot.slane %v41_v50, %v97_v54  ;;  %v2061_v28 = vrot.slane %v186_v55, %v2039_v46  ;;  %v2087_v54 = vld [vmem:[%s2593_s2] sm:$0xf]  ;;  %s1831_s2 = smov [#allocation6]  }
  0x26   :  { %v2064_v33 = vrot.slane %v190_v56, %v2039_v46  ;;  %s1494_s20 = sshll.u32 %s1831_s2, 4  ;;  %s1495_s20 = int_to_ptr.vmem [resolvable:$true] %s1494_s20 }
  0x27   :  { %574 = vmatpush1.bf16.msra.mxu0 %v1923_v19  ;;  %615 = vmatpush1.bf16.msra.mxu1 %v1925_v20  ;;  %s1800_s21 = scalar_lea.vmem %s1495_s20, 128  ;;  %p1805_p9 = scmp.lt.s32.totalorder %s1495_s20, %s1495_s20 }
  0x28   :  { %575 = vmatprep.subr.bf16.mxu0 %v1929_v21  ;;  %616 = vmatprep.subr.bf16.mxu1 %v1933_v22  ;;  %p1801_p8 = scmp.ne.s32.totalorder %s1495_s20, %s1800_s21  ;;  %p1806_p10 = scmp.lt.s32.totalorder %s1800_s21, %s1800_s21 }
  0x29   :  { %160 = vperm.xlu0 %1566, %v35_v36   ;;  %59 = vperm.xlu1 %1569, %v36_v37   ;;  %v2067_v36 = vrot.slane %v194_v57, %v2039_v46 }
  0x2a   :  { %p1807_p11 = por %p1806_p10, %p1805_p9 }
  0x2b   :  { %576 = vmatpush1.bf16.msra.mxu0 %v1935_v23  ;;  %617 = vmatpush1.bf16.msra.mxu1 %v1939_v24 }
  0x2c   :  { %577 = vmatprep.subr.bf16.mxu0 %v1941_v25  ;;  %618 = vmatprep.subr.bf16.mxu1 %v1945_v26  ;;  %p1808_p12 = pnand %p1807_p11, %p1801_p8 }
  0x2d   :  { %164 = vperm.xlu0 %1566, %v36_v37   ;;  %64 = vperm.xlu1 %1569, %v37_v38   ;;  %v2070_v37 = vrot.slane %v198_v58, %v2039_v46 }
  0x2f   :  { %578 = vmatpush1.bf16.msra.mxu0 %v1955_v29  ;;  %619 = vmatpush1.bf16.msra.mxu1 %v1957_v30 }
  0x30   :  { %579 = vmatprep.subr.bf16.mxu0 %v1961_v31  ;;  %620 = vmatprep.subr.bf16.mxu1 %v1963_v32 }
  0x31   :  { %168 = vperm.xlu0 %1566, %v37_v38   ;;  %69 = vperm.xlu1 %1569, %v38_v39   ;;  %v2072_v38 = vrot.slane %v86_v59, %v85_v51 }
  0x33   :  { %580 = vmatpush1.bf16.msra.mxu0 %v1967_v34  ;;  %621 = vmatpush1.bf16.msra.mxu1 %v1969_v35 }
  0x34   :  { %681 = vmatprep.subr.bf16.mxu0 %v1873_v1  ;;  %722 = vmatprep.subr.bf16.mxu1 %v1875_v2 }
  0x35   :  { %172 = vperm.xlu0 %1566, %v38_v39   ;;  %74 = vperm.xlu1 %1569, %v39_v40   ;;  %v2074_v39 = vrot.slane %v90_v60, %v85_v51  ;;  %v2094_v60 = vrot.slane %v2087_v54, %v85_v51 }
  0x36   :  { %598 = vmatmul.mubr.bf16.vlgmr.msra.gmra.mrb[0].mxu0 %v2596_v0  ;;  %639 = vmatmul.mubr.bf16.vlgmr.msra.gmra.mrb[0].mxu1 %v2596_v0 }
  0x37   :  { %682 = vmatpush1.bf16.msra.mxu0 %v1878_v3  ;;  %723 = vmatpush1.bf16.msra.mxu1 %v1880_v4 }
  0x38   :  { %683 = vmatprep.subr.bf16.mxu0 %v1883_v5  ;;  %724 = vmatprep.subr.bf16.mxu1 %v1887_v6 }
  0x39   :  { %713 = vmatprep.mubr.bf16.mxu0 %v2596_v0  ;;  %754 = vmatprep.mubr.bf16.mxu1 %v2596_v0 }
  0x3a   :  { %176 = vperm.xlu0 %1566, %v39_v40   ;;  %79 = vperm.xlu1 %1569, %v40_v41   ;;  %v2076_v40 = vrot.slane %v94_v61, %v85_v51 }
  0x3b   :  { %684 = vmatpush1.bf16.msra.mxu0 %v1889_v7  ;;  %725 = vmatpush1.bf16.msra.mxu1 %v1892_v8 }
  0x3c   :  { %685 = vmatprep.subr.bf16.mxu0 %v1895_v9  ;;  %726 = vmatprep.subr.bf16.mxu1 %v1897_v10 }
  0x3e   :  { %180 = vperm.xlu0 %1566, %v40_v41   ;;  %v2078_v41 = vrot.slane %v98_v62, %v85_v51 }
  0x3f   :  { %686 = vmatpush1.bf16.msra.mxu0 %v1899_v11  ;;  %727 = vmatpush1.bf16.msra.mxu1 %v1901_v12 }
  0x40   :  { %687 = vmatprep.subr.bf16.mxu0 %v1905_v13  ;;  %728 = vmatprep.subr.bf16.mxu1 %v1909_v14 }
  0x43   :  { %688 = vmatpush1.bf16.msra.mxu0 %v1911_v15  ;;  %729 = vmatpush1.bf16.msra.mxu1 %v1915_v16 }
  0x44   :  { %689 = vmatprep.subr.bf16.mxu0 %v1917_v17  ;;  %730 = vmatprep.subr.bf16.mxu1 %v1921_v18 }
  0x47   :  { %690 = vmatpush1.bf16.msra.mxu0 %v1923_v19  ;;  %731 = vmatpush1.bf16.msra.mxu1 %v1925_v20 }
  0x48   :  { %691 = vmatprep.subr.bf16.mxu0 %v1929_v21  ;;  %732 = vmatprep.subr.bf16.mxu1 %v1933_v22 }
  0x4b   :  { %692 = vmatpush1.bf16.msra.mxu0 %v1935_v23  ;;  %733 = vmatpush1.bf16.msra.mxu1 %v1939_v24 }
  0x4c   :  { %693 = vmatprep.subr.bf16.mxu0 %v1941_v25  ;;  %734 = vmatprep.subr.bf16.mxu1 %v1945_v26 }
  0x4f   :  { %694 = vmatpush1.bf16.msra.mxu0 %v1955_v29  ;;  %735 = vmatpush1.bf16.msra.mxu1 %v1957_v30 }
  0x50   :  { %695 = vmatprep.subr.bf16.mxu0 %v1961_v31  ;;  %736 = vmatprep.subr.bf16.mxu1 %v1963_v32 }
  0x53   :  { %696 = vmatpush1.bf16.msra.mxu0 %v1967_v34  ;;  %737 = vmatpush1.bf16.msra.mxu1 %v1969_v35 }
  0x54   :  { %797 = vmatprep.subr.bf16.mxu0 %v1873_v1  ;;  %838 = vmatprep.subr.bf16.mxu1 %v1875_v2 }
  0x98   :  { %v2034_v44 = vpop.permute.xlu1 %49 }
  0x99   :  { %2619 = vst [vmem:[#allocation14_spill] sm:$0xff] %v2034_v44 }
  0x9d   :  { %v2036_v45 = vpop.permute.xlu0 %44  ;;  %v2056_v63 = vpop.permute.xlu1 %156 }
  0x9e   :  { %2620 = vst [vmem:[#allocation15_spill] sm:$0xff] %v2056_v63 }
  0xa4   :  { %v2058_v27 = vpop.permute.xlu0 %152  ;;  %v55_v55 = vpop.permute.xlu1 %54 }
  0xa5   :  { %v127_v56 = vmul.f32 %v2072_v38, %v55_v55  ;;  %v128_v57 = vmul.f32 %v2074_v39, %v55_v55  ;;  %v129_v58 = vmul.f32 %v2076_v40, %v55_v55  ;;  %v130_v59 = vmul.f32 %v2078_v41, %v55_v55 }
  0xa8   :  { %v161_v42 = vpop.permute.xlu0 %160  ;;  %v60_v52 = vpop.permute.xlu1 %59 }
  0xa9   :  { %v227_v48 = vmul.f32 %v2061_v28, %v161_v42  ;;  %v228_v49 = vmul.f32 %v2064_v33, %v161_v42  ;;  %v229_v50 = vmul.f32 %v2067_v36, %v161_v42  ;;  %v230_v53 = vmul.f32 %v2070_v37, %v161_v42 }
  0xaa   :  { %v131_v51 = vmul.f32 %v2072_v38, %v60_v52  ;;  %v132_v34 = vmul.f32 %v2074_v39, %v60_v52 }
  0xab   :  { %v259_v62 = vadd.f32 %v227_v48, %v127_v56  ;;  %v2096_v42 = vadd.f32 %v229_v50, %v129_v58  ;;  %v2098_v0 = vadd.f32 %v228_v49, %v128_v57  ;;  %v2100_v47 = vadd.f32 %v230_v53, %v130_v59 }
  0xac   :  { %v165_v61 = vpop.permute.xlu0 %164  ;;  %v133_v48 = vmul.f32 %v2076_v40, %v60_v52  ;;  %v134_v49 = vmul.f32 %v2078_v41, %v60_v52  ;;  %v123_v50 = vmul.f32 %v2072_v38, %v2034_v44  ;;  %v223_v53 = vmul.f32 %v2061_v28, %v2056_v63 }
  0xad   :  { %2621 = vst [vmem:[#allocation16_spill] sm:$0xff] %v2096_v42  ;;  %2622 = vst [vmem:[#allocation17_spill] sm:$0xff] %v2098_v0  ;;  %v231_v2 = vmul.f32 %v2061_v28, %v165_v61  ;;  %v232_v1 = vmul.f32 %v2064_v33, %v165_v61  ;;  %v233_v35 = vmul.f32 %v2067_v36, %v165_v61  ;;  %v65_v0 = vpop.permute.xlu1 %64 }
  0xae   :  { %2623 = vst [vmem:[#allocation18_spill] sm:$0xff] %v2100_v47  ;;  %v234_v55 = vmul.f32 %v2070_v37, %v165_v61  ;;  %v2115_v56 = vadd.f32 %v2094_v60, %v259_v62  ;;  %v135_v63 = vmul.f32 %v2072_v38, %v65_v0  ;;  %v136_v62 = vmul.f32 %v2074_v39, %v65_v0 }
  0xaf   :  { %v263_v58 = vadd.f32 %v231_v2, %v131_v51  ;;  %v2117_v59 = vadd.f32 %v233_v35, %v133_v48  ;;  %v2119_v61 = vadd.f32 %v232_v1, %v132_v34  ;;  %v255_v35 = vadd.f32 %v223_v53, %v123_v50 }
  0xb0   :  { %2624 = vst [vmem:[#allocation19_spill] sm:$0xff] %v2115_v56  ;;  %v169_v57 = vpop.permute.xlu0 %168  ;;  %v2121_v47 = vadd.f32 %v234_v55, %v134_v49  ;;  %v137_v56 = vmul.f32 %v2076_v40, %v65_v0  ;;  %v138_v34 = vmul.f32 %v2078_v41, %v65_v0 }
  0xb1   :  { %2625 = vst [vmem:[#allocation20_spill] sm:$0xff] %v2117_v59  ;;  %2626 = vst [vmem:[#allocation21_spill] sm:$0xff] %v2119_v61  ;;  %v235_v52 = vmul.f32 %v2061_v28, %v169_v57  ;;  %v236_v42 = vmul.f32 %v2064_v33, %v169_v57  ;;  %v237_v44 = vmul.f32 %v2067_v36, %v169_v57 }
  0xb2   :  { %2627 = vst [vmem:[#allocation22_spill] sm:$0xff] %v2121_v47  ;;  %v238_v2 = vmul.f32 %v2070_v37, %v169_v57  ;;  %v2131_v1 = vadd.f32 %v2094_v60, %v263_v58  ;;  %v70_v47 = vpop.permute.xlu1 %69 }
  0xb3   :  { %v267_v51 = vadd.f32 %v235_v52, %v135_v63  ;;  %v2134_v48 = vadd.f32 %v237_v44, %v137_v56  ;;  %v2136_v49 = vadd.f32 %v236_v42, %v136_v62  ;;  %v139_v50 = vmul.f32 %v2072_v38, %v70_v47 }
  0xb4   :  { %2628 = vst [vmem:[#allocation23_spill] sm:$0xff] %v2131_v1  ;;  %v173_v55 = vpop.permute.xlu0 %172  ;;  %v140_v53 = vmul.f32 %v2074_v39, %v70_v47  ;;  %v141_v57 = vmul.f32 %v2076_v40, %v70_v47  ;;  %v142_v0 = vmul.f32 %v2078_v41, %v70_v47  ;;  %v2147_v63 = vadd.f32 %v2094_v60, %v255_v35 }
  0xb5   :  { %2629 = vst [vmem:[#allocation24_spill] sm:$0xff] %v2134_v48  ;;  %2630 = vst [vmem:[#allocation25_spill] sm:$0xff] %v2136_v49  ;;  %v239_v61 = vmul.f32 %v2061_v28, %v173_v55  ;;  %v240_v59 = vmul.f32 %v2064_v33, %v173_v55  ;;  %v241_v32 = vmul.f32 %v2067_v36, %v173_v55 }
  0xb6   :  { %v242_v44 = vmul.f32 %v2070_v37, %v173_v55  ;;  %v2150_v42 = vadd.f32 %v2094_v60, %v267_v51  ;;  %v2152_v58 = vadd.f32 %v238_v2, %v138_v34  ;;  %v75_v48 = vpop.permute.xlu1 %74 }
  0xb7   :  { %v271_v52 = vadd.f32 %v239_v61, %v139_v50  ;;  %v2154_v62 = vadd.f32 %v241_v32, %v141_v57  ;;  %v2156_v49 = vadd.f32 %v240_v59, %v140_v53  ;;  %v143_v35 = vmul.f32 %v2072_v38, %v75_v48 }
  0xb8   :  { %2631 = vst [vmem:[#allocation26_spill] sm:$0xff] %v2150_v42  ;;  %2632 = vst [vmem:[#allocation27_spill] sm:$0xff] %v2152_v58  ;;  %v144_v51 = vmul.f32 %v2074_v39, %v75_v48  ;;  %v145_v42 = vmul.f32 %v2076_v40, %v75_v48  ;;  %v146_v2 = vmul.f32 %v2078_v41, %v75_v48 }
  0xb9   :  { %v177_v56 = vpop.permute.xlu0 %176  ;;  %2633 = vst [vmem:[#allocation28_spill] sm:$0xff] %v2154_v62  ;;  %2634 = vst [vmem:[#allocation29_spill] sm:$0xff] %v2156_v49  ;;  %v2167_v59 = vadd.f32 %v2094_v60, %v271_v52  ;;  %v2169_v34 = vadd.f32 %v242_v44, %v142_v0 }
  0xba   :  { %v243_v1 = vmul.f32 %v2061_v28, %v177_v56  ;;  %v244_v47 = vmul.f32 %v2064_v33, %v177_v56  ;;  %v245_v55 = vmul.f32 %v2067_v36, %v177_v56  ;;  %v246_v32 = vmul.f32 %v2070_v37, %v177_v56  ;;  %v80_v49 = vpop.permute.xlu1 %79 }
  0xbb   :  { %2635 = vst [vmem:[#allocation30_spill] sm:$0xff] %v2167_v59  ;;  %v147_v52 = vmul.f32 %v2072_v38, %v80_v49  ;;  %v148_v59 = vmul.f32 %v2074_v39, %v80_v49  ;;  %v149_v0 = vmul.f32 %v2076_v40, %v80_v49 }
  0xbc   :  { %v275_v50 = vadd.f32 %v243_v1, %v143_v35  ;;  %v2171_v53 = vadd.f32 %v245_v55, %v145_v42  ;;  %v2173_v57 = vadd.f32 %v244_v47, %v144_v51  ;;  %v150_v1 = vmul.f32 %v2078_v41, %v80_v49 }
  0xbd   :  { %v181_v61 = vpop.permute.xlu0 %180  ;;  %v2186_v42 = vadd.f32 %v246_v32, %v146_v2  ;;  %v219_v49 = vmul.f32 %v2061_v28, %v2058_v27  ;;  %v120_v2 = vmul.f32 %v2074_v39, %v2036_v45 }
  0xbe   :  { %2636 = vst [vmem:[#allocation31_spill] sm:$0xff] %v2173_v57  ;;  %v247_v62 = vmul.f32 %v2061_v28, %v181_v61  ;;  %v248_v58 = vmul.f32 %v2064_v33, %v181_v61  ;;  %v249_v48 = vmul.f32 %v2067_v36, %v181_v61  ;;  %v250_v56 = vmul.f32 %v2070_v37, %v181_v61 }
  0xbf   :  { %v2184_v44 = vadd.f32 %v2094_v60, %v275_v50  ;;  %v119_v57 = vmul.f32 %v2072_v38, %v2036_v45  ;;  %v121_v50 = vmul.f32 %v2076_v40, %v2036_v45  ;;  %v221_v38 = vmul.f32 %v2067_v36, %v2058_v27 }
  0xc0   :  { %v279_v47 = vadd.f32 %v247_v62, %v147_v52  ;;  %v2188_v55 = vadd.f32 %v249_v48, %v149_v0  ;;  %v2190_v35 = vadd.f32 %v248_v58, %v148_v59  ;;  %v2192_v51 = vadd.f32 %v250_v56, %v150_v1 }
  0xc1   :  { %2637 = vst [vmem:[#allocation32_spill] sm:$0xff] %v2184_v44  ;;  %v220_v62 = vmul.f32 %v2064_v33, %v2058_v27  ;;  %v251_v32 = vadd.f32 %v219_v49, %v119_v57  ;;  %v2207_v59 = vrot.slane %v2087_v54, %v2039_v46  ;;  %v222_v46 = vmul.f32 %v2070_v37, %v2058_v27 }
  0xc2   :  { %2638 = vst [vmem:[#allocation33_spill] sm:$0xff] %v2188_v55  ;;  %2639 = vst [vmem:[#allocation34_spill] sm:$0xff] %v2190_v35  ;;  %v2195_v61 = vadd.f32 %v2094_v60, %v279_v47  ;;  %v122_v47 = vmul.f32 %v2078_v41, %v2036_v45  ;;  %v2643_v45 = vsub.s32 3, %v2032_v43 }
  0xc3   :  { %2640 = vst [vmem:[#allocation35_spill] sm:$0xff] %v2192_v51  ;;  %v252_v58 = vadd.f32 %v220_v62, %v120_v2  ;;  %v305_v28 = vadd.f32 %v2094_v60, %v251_v32  ;;  %v253_v51 = vadd.f32 %v221_v38, %v121_v50  ;;  %v2642_v60 = vsub.s32 2, %v2032_v43 }
  0xc4   :  { %2641 = vst [vmem:[#allocation36_spill] sm:$0xff] %v2195_v61  ;;  %v254_v35 = vadd.f32 %v222_v46, %v122_v47  ;;  %v2227_v55 = vrot.slane %v2087_v54, %v2643_v45  ;;  %v2645_v45 = vld [vmem:[#allocation11_spill] sm:$0xff] }
  0xc5   :  { %v306_v52 = vadd.f32 %v2207_v59, %v252_v58  ;;  %v2222_v32 = vrot.slane %v2087_v54, %v2642_v60 }
  0xc6   :  { %v308_v50 = vadd.f32 %v2227_v55, %v254_v35 }
  0xc7   :  { %v307_v27 = vadd.f32 %v2222_v32, %v253_v51 }
 0x109   :  { %v599_v48 = vpop.f32.mrb[0].mxu0  ;;  %v640_v56 = vpop.f32.mrb[0].mxu1 }
 0x10a   :  { %v647_v0 = vadd.f32 %v599_v48, %v305_v28  ;;  %v601_v1 = vpop.f32.mrb[1].mxu0  ;;  %v642_v57 = vpop.f32.mrb[1].mxu1 }
 0x10b   :  { %v648_v49 = vadd.f32 %v601_v1, %v306_v52  ;;  %v603_v2 = vpop.f32.mrb[2].mxu0  ;;  %v644_v62 = vpop.f32.mrb[2].mxu1  ;;  %v649_v52 = vadd.f32 %v640_v56, %v307_v27  ;;  %v650_v38 = vadd.f32 %v642_v57, %v308_v50  ;;  %v2646_v27 = vld [vmem:[#allocation12_spill] sm:$0xff]  ;;  %v2648_v50 = vld [vmem:[#allocation9_spill] sm:$0xff] }
 0x10c   :  { %v1535_v61 = vmul.f32 -1.442695, %v647_v0  ;;  %v604_v58 = vpop.f32.mrb[3].mxu0  ;;  %v645_v28 = vpop.f32.mrb[3].mxu1 }
 0x10d   :  { %v1536_v48 = vmul.f32 -1.442695, %v648_v49  ;;  %v1537_v0 = vmul.f32 -1.442695, %v649_v52  ;;  %v2647_v52 = vld [vmem:[#allocation13_spill] sm:$0xff] }
 0x10e   :  { %1618 = vpow2.f32 %v1535_v61 }
 0x10f   :  { %1620 = vpow2.f32 %v1536_v48  ;;  %v2644_v48 = vmov 0  }
 0x110   :  { %1622 = vtanh.f32 %v650_v38  ;;  %v2649_v38 = vld [vmem:[#allocation10_spill] sm:$0xff] }
 0x111   :  { %1624 = vpow2.f32 %v1537_v0  ;;  %v2650_v0 = vld [vmem:[#allocation14_spill] sm:$0xff] }
 0x118   :  { %v1619_v1 = vpop.eup %1618 }
 0x119   :  { %v660_v2 = vadd.f32 1.0, %v1619_v1  ;;  %v1621_v62 = vpop.eup %1620  ;;  %v125_v1 = vmul.f32 %v2076_v40, %v2650_v0 }
 0x11a   :  { %v661_v61 = vadd.f32 1.0, %v1621_v62  ;;  %v1623_v43 = vpop.eup %1622 }
 0x11b   :  { %1626 = vrcp.f32 %v660_v2  ;;  %v1625_v47 = vpop.eup %1624  ;;  %v2651_v2 = vld [vmem:[#allocation15_spill] sm:$0xff] }
 0x11c   :  { %1628 = vrcp.f32 %v661_v61  ;;  %v662_v51 = vadd.f32 1.0, %v1625_v47  ;;  %v225_v62 = vmul.f32 %v2067_v36, %v2651_v2  ;;  %v124_v61 = vmul.f32 %v2074_v39, %v2650_v0 }
 0x11d   :  { %v224_v47 = vmul.f32 %v2064_v33, %v2651_v2 }
 0x11e   :  { %1630 = vrcp.f32 %v662_v51 }
 0x125   :  { %v1627_v54 = vpop.eup %1626 }
 0x126   :  { %v671_v46 = vmul.f32 %v1627_v54, %v1623_v43  ;;  %v1629_v49 = vpop.eup %1628  ;;  %v126_v43 = vmul.f32 %v2078_v41, %v2650_v0  ;;  %v226_v54 = vmul.f32 %v2070_v37, %v2651_v2 }
 0x127   :  { %v670_v60 = vmul.f32 0.0, %v1629_v49  ;;  %v256_v49 = vadd.f32 %v224_v47, %v124_v61 }
 0x128   :  { %v1631_v35 = vpop.eup %1630  ;;  %v258_v51 = vadd.f32 %v226_v54, %v126_v43 }
 0x129   :  { %v2231_v56 = vadd.f32 %v671_v46, %v670_v60  ;;  %v257_v46 = vadd.f32 %v225_v62, %v125_v1  ;;  %v310_v36 = vadd.f32 %v2207_v59, %v256_v49 }
 0x12a   :  { %v312_v39 = vadd.f32 %v2227_v55, %v258_v51 }
 0x12b   :  { %1632 = vtanh.f32 %v2231_v56  ;;  %v311_v40 = vadd.f32 %v2222_v32, %v257_v46 }
 0x135   :  { %v1633_v57 = vpop.eup %1632 }
 0x136   :  { %v674_v58 = vmul.f32 %v1633_v57, %v1631_v35 }
 0x138   :  { %v680_v28 = vpack.c.bf16 %v674_v58, %v674_v58 }
 0x13a   :  { %714 = vmatmul.mubr.bf16.vlgmr.msra.gmra.mrb[4].mxu0 %v680_v28  ;;  %755 = vmatmul.mubr.bf16.vlgmr.msra.gmra.mrb[4].mxu1 %v680_v28 }
 0x13b   :  { %798 = vmatpush1.bf16.msra.mxu0 %v1878_v3  ;;  %839 = vmatpush1.bf16.msra.mxu1 %v1880_v4 }
 0x13c   :  { %799 = vmatprep.subr.bf16.mxu0 %v1883_v5  ;;  %840 = vmatprep.subr.bf16.mxu1 %v1887_v6 }
 0x13d   :  { %829 = vmatprep.mubr.bf16.mxu0 %v2644_v48  ;;  %870 = vmatprep.mubr.bf16.mxu1 %v2644_v48 }
 0x13f   :  { %800 = vmatpush1.bf16.msra.mxu0 %v1889_v7  ;;  %841 = vmatpush1.bf16.msra.mxu1 %v1892_v8 }
 0x140   :  { %801 = vmatprep.subr.bf16.mxu0 %v1895_v9  ;;  %842 = vmatprep.subr.bf16.mxu1 %v1897_v10 }
 0x143   :  { %802 = vmatpush1.bf16.msra.mxu0 %v1899_v11  ;;  %843 = vmatpush1.bf16.msra.mxu1 %v1901_v12 }
 0x144   :  { %803 = vmatprep.subr.bf16.mxu0 %v1905_v13  ;;  %844 = vmatprep.subr.bf16.mxu1 %v1909_v14 }
 0x147   :  { %804 = vmatpush1.bf16.msra.mxu0 %v1911_v15  ;;  %845 = vmatpush1.bf16.msra.mxu1 %v1915_v16 }
 0x148   :  { %805 = vmatprep.subr.bf16.mxu0 %v1917_v17  ;;  %846 = vmatprep.subr.bf16.mxu1 %v1921_v18 }
 0x14b   :  { %806 = vmatpush1.bf16.msra.mxu0 %v1923_v19  ;;  %847 = vmatpush1.bf16.msra.mxu1 %v1925_v20 }
 0x14c   :  { %807 = vmatprep.subr.bf16.mxu0 %v1929_v21  ;;  %848 = vmatprep.subr.bf16.mxu1 %v1933_v22 }
 0x14f   :  { %808 = vmatpush1.bf16.msra.mxu0 %v1935_v23  ;;  %849 = vmatpush1.bf16.msra.mxu1 %v1939_v24 }
 0x150   :  { %809 = vmatprep.subr.bf16.mxu0 %v1941_v25  ;;  %850 = vmatprep.subr.bf16.mxu1 %v1945_v26 }
 0x153   :  { %810 = vmatpush1.bf16.msra.mxu0 %v1955_v29  ;;  %851 = vmatpush1.bf16.msra.mxu1 %v1957_v30 }
 0x154   :  { %811 = vmatprep.subr.bf16.mxu0 %v1961_v31  ;;  %852 = vmatprep.subr.bf16.mxu1 %v2645_v45 }
 0x157   :  { %812 = vmatpush1.bf16.msra.mxu0 %v2646_v27  ;;  %853 = vmatpush1.bf16.msra.mxu1 %v2647_v52 }
 0x158   :  { %913 = vmatprep.subr.bf16.mxu0 %v2648_v50  ;;  %954 = vmatprep.subr.bf16.mxu1 %v2649_v38 }
 0x20d   :  { %v715_v60 = vpop.f32.mrb[4].mxu0  ;;  %v756_v35 = vpop.f32.mrb[4].mxu1 }
 0x20e   :  { %v763_v57 = vadd.f32 %v715_v60, %v2147_v63  ;;  %v765_v41 = vadd.f32 %v756_v35, %v311_v40  ;;  %v717_v58 = vpop.f32.mrb[5].mxu0  ;;  %v758_v28 = vpop.f32.mrb[5].mxu1 }
 0x20f   :  { %v764_v33 = vadd.f32 %v717_v58, %v310_v36  ;;  %v766_v0 = vadd.f32 %v758_v28, %v312_v39  ;;  %v719_v44 = vpop.f32.mrb[6].mxu0  ;;  %v760_v37 = vpop.f32.mrb[6].mxu1 }
 0x210   :  { %v1538_v1 = vmul.f32 -1.442695, %v763_v57  ;;  %v720_v2 = vpop.f32.mrb[7].mxu0  ;;  %v761_v62 = vpop.f32.mrb[7].mxu1  ;;  %v1540_v43 = vmul.f32 -1.442695, %v765_v41 }
 0x211   :  { %v1539_v61 = vmul.f32 -1.442695, %v764_v33  ;;  %v2654_v62 = vld [vmem:[#allocation18_spill] sm:$0xff] }
 0x212   :  { %1634 = vpow2.f32 %v1538_v1  ;;  %v2653_v1 = vld [vmem:[#allocation17_spill] sm:$0xff] }
 0x213   :  { %1636 = vpow2.f32 %v1539_v61  ;;  %v314_v2 = vadd.f32 %v2207_v59, %v2653_v1  ;;  %v316_v61 = vadd.f32 %v2227_v55, %v2654_v62 }
 0x214   :  { %1638 = vtanh.f32 %v766_v0 }
 0x215   :  { %1640 = vpow2.f32 %v1540_v43  ;;  %v2655_v43 = vld [vmem:[#allocation19_spill] sm:$0xff] }
 0x21c   :  { %v1635_v47 = vpop.eup %1634 }
 0x21d   :  { %v776_v54 = vadd.f32 1.0, %v1635_v47  ;;  %v1637_v46 = vpop.eup %1636 }
 0x21e   :  { %v777_v63 = vadd.f32 1.0, %v1637_v46  ;;  %v1639_v49 = vpop.eup %1638 }
 0x21f   :  { %1642 = vrcp.f32 %v776_v54  ;;  %v1641_v51 = vpop.eup %1640 }
 0x220   :  { %1644 = vrcp.f32 %v777_v63  ;;  %v778_v35 = vadd.f32 1.0, %v1641_v51 }
 0x222   :  { %1646 = vrcp.f32 %v778_v35 }
 0x229   :  { %v1643_v40 = vpop.eup %1642 }
 0x22a   :  { %v787_v44 = vmul.f32 %v1643_v40, %v1639_v49  ;;  %v1645_v60 = vpop.eup %1644 }
 0x22b   :  { %v786_v36 = vmul.f32 %v1645_v60, %v2231_v56  ;;  %v2652_v56 = vld [vmem:[#allocation16_spill] sm:$0xff] }
 0x22c   :  { %v1647_v57 = vpop.eup %1646  ;;  %v315_v33 = vadd.f32 %v2222_v32, %v2652_v56 }
 0x22d   :  { %v2285_v39 = vadd.f32 %v787_v44, %v786_v36 }
 0x22f   :  { %1648 = vtanh.f32 %v2285_v39 }
 0x239   :  { %v1649_v41 = vpop.eup %1648 }
 0x23a   :  { %v790_v58 = vmul.f32 %v1649_v41, %v1647_v57 }
 0x23c   :  { %v796_v28 = vpack.c.bf16 %v790_v58, %v790_v58 }
 0x23e   :  { %830 = vmatmul.mubr.bf16.vlgmr.msra.gmra.mrb[8].mxu0 %v796_v28  ;;  %871 = vmatmul.mubr.bf16.vlgmr.msra.gmra.mrb[8].mxu1 %v796_v28 }
 0x23f   :  { %914 = vmatpush1.bf16.msra.mxu0 %v1878_v3  ;;  %955 = vmatpush1.bf16.msra.mxu1 %v1880_v4 }
 0x240   :  { %915 = vmatprep.subr.bf16.mxu0 %v1883_v5  ;;  %956 = vmatprep.subr.bf16.mxu1 %v1887_v6 }
 0x241   :  { %945 = vmatprep.mubr.bf16.mxu0 %v2644_v48  ;;  %986 = vmatprep.mubr.bf16.mxu1 %v2644_v48 }
 0x243   :  { %916 = vmatpush1.bf16.msra.mxu0 %v1889_v7  ;;  %957 = vmatpush1.bf16.msra.mxu1 %v1892_v8 }
 0x244   :  { %917 = vmatprep.subr.bf16.mxu0 %v1895_v9  ;;  %958 = vmatprep.subr.bf16.mxu1 %v1897_v10 }
 0x247   :  { %918 = vmatpush1.bf16.msra.mxu0 %v1899_v11  ;;  %959 = vmatpush1.bf16.msra.mxu1 %v1901_v12 }
 0x248   :  { %919 = vmatprep.subr.bf16.mxu0 %v1905_v13  ;;  %960 = vmatprep.subr.bf16.mxu1 %v1909_v14 }
 0x24b   :  { %920 = vmatpush1.bf16.msra.mxu0 %v1911_v15  ;;  %961 = vmatpush1.bf16.msra.mxu1 %v1915_v16 }
 0x24c   :  { %921 = vmatprep.subr.bf16.mxu0 %v1917_v17  ;;  %962 = vmatprep.subr.bf16.mxu1 %v1921_v18 }
 0x24f   :  { %922 = vmatpush1.bf16.msra.mxu0 %v1923_v19  ;;  %963 = vmatpush1.bf16.msra.mxu1 %v1925_v20 }
 0x250   :  { %923 = vmatprep.subr.bf16.mxu0 %v1929_v21  ;;  %964 = vmatprep.subr.bf16.mxu1 %v1933_v22 }
 0x253   :  { %924 = vmatpush1.bf16.msra.mxu0 %v1935_v23  ;;  %965 = vmatpush1.bf16.msra.mxu1 %v1939_v24 }
 0x254   :  { %925 = vmatprep.subr.bf16.mxu0 %v1941_v25  ;;  %966 = vmatprep.subr.bf16.mxu1 %v1945_v26 }
 0x257   :  { %926 = vmatpush1.bf16.msra.mxu0 %v1955_v29  ;;  %967 = vmatpush1.bf16.msra.mxu1 %v1957_v30 }
 0x258   :  { %927 = vmatprep.subr.bf16.mxu0 %v1961_v31  ;;  %968 = vmatprep.subr.bf16.mxu1 %v2645_v45 }
 0x25b   :  { %928 = vmatpush1.bf16.msra.mxu0 %v2646_v27  ;;  %969 = vmatpush1.bf16.msra.mxu1 %v2647_v52 }
 0x25c   :  { %1029 = vmatprep.subr.bf16.mxu0 %v2648_v50  ;;  %1070 = vmatprep.subr.bf16.mxu1 %v2649_v38 }
 0x311   :  { %v831_v0 = vpop.f32.mrb[8].mxu0  ;;  %v872_v37 = vpop.f32.mrb[8].mxu1 }
 0x312   :  { %v879_v47 = vadd.f32 %v831_v0, %v2655_v43  ;;  %v881_v54 = vadd.f32 %v872_v37, %v315_v33  ;;  %v833_v46 = vpop.f32.mrb[9].mxu0  ;;  %v874_v63 = vpop.f32.mrb[9].mxu1 }
 0x313   :  { %v880_v49 = vadd.f32 %v833_v46, %v314_v2  ;;  %v882_v50 = vadd.f32 %v874_v63, %v316_v61  ;;  %v835_v51 = vpop.f32.mrb[10].mxu0  ;;  %v876_v38 = vpop.f32.mrb[10].mxu1 }
 0x314   :  { %v1541_v40 = vmul.f32 -1.442695, %v879_v47  ;;  %v836_v44 = vpop.f32.mrb[11].mxu0  ;;  %v877_v60 = vpop.f32.mrb[11].mxu1  ;;  %v1543_v36 = vmul.f32 -1.442695, %v881_v54 }
 0x315   :  { %v1542_v35 = vmul.f32 -1.442695, %v880_v49 }
 0x316   :  { %1650 = vpow2.f32 %v1541_v40 }
 0x317   :  { %1652 = vpow2.f32 %v1542_v35 }
 0x318   :  { %1654 = vtanh.f32 %v882_v50 }
 0x319   :  { %1656 = vpow2.f32 %v1543_v36  ;;  %v2382_v36 = vld [vmem:[#allocation3] ss:$16 sps:$4 sm:$0xff]  }
 0x320   :  { %v1651_v57 = vpop.eup %1650 }
 0x321   :  { %v892_v41 = vadd.f32 1.0, %v1651_v57  ;;  %v1653_v58 = vpop.eup %1652  ;;  %v2385_v57 = vld [vmem:[#allocation3 + $0x8] ss:$16 sps:$4 sm:$0xff]  }
 0x322   :  { %v893_v28 = vadd.f32 1.0, %v1653_v58  ;;  %v1655_v56 = vpop.eup %1654  ;;  %v2391_v58 = vld [vmem:[#allocation3 + $0x2c] ss:$16 sps:$4 sm:$0xff]  }
 0x323   :  { %1658 = vrcp.f32 %v892_v41  ;;  %v1657_v33 = vpop.eup %1656  ;;  %v2388_v41 = vld [vmem:[#allocation3 + $0x24] ss:$16 sps:$4 sm:$0xff]  }
 0x324   :  { %1660 = vrcp.f32 %v893_v28  ;;  %v894_v2 = vadd.f32 1.0, %v1657_v33  ;;  %v2396_v28 = vld [vmem:[#allocation3 + $0x20] ss:$16 sps:$4 sm:$0xff]   ;;  %v2402_v33 = vld [vmem:[#allocation3 + $0x44] ss:$16 sps:$4 sm:$0xff]  }
 0x326   :  { %1662 = vrcp.f32 %v894_v2  ;;  %v2414_v2 = vld [vmem:[#allocation3 + $0x64] ss:$16 sps:$4 sm:$0xff]  }
 0x32d   :  { %v1659_v0 = vpop.eup %1658 }
 0x32e   :  { %v903_v37 = vmul.f32 %v1659_v0, %v1655_v56  ;;  %v1661_v1 = vpop.eup %1660  ;;  %v2399_v56 = vld [vmem:[#allocation3 + $0x28] ss:$16 sps:$4 sm:$0xff]   ;;  %v2405_v0 = vld [vmem:[#allocation3 + $0x4c] ss:$16 sps:$4 sm:$0xff]  }
 0x32f   :  { %v902_v62 = vmul.f32 %v1661_v1, %v2285_v39  ;;  %v2411_v1 = vld [vmem:[#allocation3 + $0x48] ss:$16 sps:$4 sm:$0xff]  }
 0x330   :  { %v1663_v43 = vpop.eup %1662 }
 0x331   :  { %v2330_v61 = vadd.f32 %v903_v37, %v902_v62  ;;  %v2408_v37 = vld [vmem:[#allocation3 + $0x40] ss:$16 sps:$4 sm:$0xff]   ;;  %v2417_v62 = vld [vmem:[#allocation3 + $0x6c] ss:$16 sps:$4 sm:$0xff]  }
 0x333   :  { %1664 = vtanh.f32 %v2330_v61 }
 0x33d   :  { %v1665_v47 = vpop.eup %1664 }
 0x33e   :  { %v906_v54 = vmul.f32 %v1665_v47, %v1663_v43  ;;  %v2423_v43 = vld [vmem:[#allocation3 + $0x68] ss:$16 sps:$4 sm:$0xff]   ;;  %v2426_v47 = vld [vmem:[#allocation3 + $0x84] ss:$16 sps:$4 sm:$0xff]  }
 0x340   :  { %v912_v46 = vpack.c.bf16 %v906_v54, %v906_v54  ;;  %v2429_v54 = vld [vmem:[#allocation3 + $0x8c] ss:$16 sps:$4 sm:$0xff]  }
 0x342   :  { %946 = vmatmul.mubr.bf16.vlgmr.msra.gmra.mrb[12].mxu0 %v912_v46  ;;  %987 = vmatmul.mubr.bf16.vlgmr.msra.gmra.mrb[12].mxu1 %v912_v46  ;;  %v2432_v46 = vld [vmem:[#allocation3 + $0x80] ss:$16 sps:$4 sm:$0xff]  }
 0x343   :  { %1030 = vmatpush1.bf16.msra.mxu0 %v1878_v3  ;;  %1071 = vmatpush1.bf16.msra.mxu1 %v1880_v4  ;;  %v2365_v3 = vld [vmem:[#allocation3 + $0x4] ss:$16 sps:$4 sm:$0xff]   ;;  %v2368_v4 = vld [vmem:[#allocation3 + $0xc] ss:$16 sps:$4 sm:$0xff]  }
 0x344   :  { %1031 = vmatprep.subr.bf16.mxu0 %v1883_v5  ;;  %1072 = vmatprep.subr.bf16.mxu1 %v1887_v6  ;;  %v2656_v5 = vld [vmem:[#allocation20_spill] sm:$0xff] }
 0x345   :  { %1061 = vmatprep.mubr.bf16.mxu0 %v2644_v48  ;;  %1102 = vmatprep.mubr.bf16.mxu1 %v2644_v48  ;;  %v319_v6 = vadd.f32 %v2222_v32, %v2656_v5  ;;  %v2435_v5 = vld [vmem:[#allocation3 + $0x88] ss:$16 sps:$4 sm:$0xff]  }
 0x347   :  { %1032 = vmatpush1.bf16.msra.mxu0 %v1889_v7  ;;  %1073 = vmatpush1.bf16.msra.mxu1 %v1892_v8 }
 0x348   :  { %1033 = vmatprep.subr.bf16.mxu0 %v1895_v9  ;;  %1074 = vmatprep.subr.bf16.mxu1 %v1897_v10  ;;  %v2657_v9 = vld [vmem:[#allocation21_spill] sm:$0xff] }
 0x349   :  { %v318_v10 = vadd.f32 %v2207_v59, %v2657_v9  ;;  %v2447_v9 = vld [vmem:[#allocation3 + $0xa8] ss:$16 sps:$4 sm:$0xff]  }
 0x34b   :  { %1034 = vmatpush1.bf16.msra.mxu0 %v1899_v11  ;;  %1075 = vmatpush1.bf16.msra.mxu1 %v1901_v12  ;;  %v2658_v11 = vld [vmem:[#allocation22_spill] sm:$0xff] }
 0x34c   :  { %1035 = vmatprep.subr.bf16.mxu0 %v1905_v13  ;;  %1076 = vmatprep.subr.bf16.mxu1 %v1909_v14  ;;  %v320_v12 = vadd.f32 %v2227_v55, %v2658_v11  ;;  %v2659_v13 = vld [vmem:[#allocation23_spill] sm:$0xff] }
 0x34d   :  { %v2453_v11 = vld [vmem:[#allocation3 + $0xcc] ss:$16 sps:$4 sm:$0xff]  }
 0x34f   :  { %1036 = vmatpush1.bf16.msra.mxu0 %v1911_v15  ;;  %1077 = vmatpush1.bf16.msra.mxu1 %v1915_v16 }
 0x350   :  { %1037 = vmatprep.subr.bf16.mxu0 %v1917_v17  ;;  %1078 = vmatprep.subr.bf16.mxu1 %v1921_v18 }
 0x353   :  { %1038 = vmatpush1.bf16.msra.mxu0 %v1923_v19  ;;  %1079 = vmatpush1.bf16.msra.mxu1 %v1925_v20 }
 0x354   :  { %1039 = vmatprep.subr.bf16.mxu0 %v1929_v21  ;;  %1080 = vmatprep.subr.bf16.mxu1 %v1933_v22 }
 0x357   :  { %1040 = vmatpush1.bf16.msra.mxu0 %v1935_v23  ;;  %1081 = vmatpush1.bf16.msra.mxu1 %v1939_v24 }
 0x358   :  { %1041 = vmatprep.subr.bf16.mxu0 %v1941_v25  ;;  %1082 = vmatprep.subr.bf16.mxu1 %v1945_v26 }
 0x35b   :  { %1042 = vmatpush1.bf16.msra.mxu0 %v1955_v29  ;;  %1083 = vmatpush1.bf16.msra.mxu1 %v1957_v30 }
 0x35c   :  { %1043 = vmatprep.subr.bf16.mxu0 %v1961_v31  ;;  %1084 = vmatprep.subr.bf16.mxu1 %v2645_v45 }
 0x35f   :  { %1044 = vmatpush1.bf16.msra.mxu0 %v2646_v27  ;;  %1085 = vmatpush1.bf16.msra.mxu1 %v2647_v52 }
 0x360   :  { %1145 = vmatprep.subr.bf16.mxu0 %v2365_v3  ;;  %1186 = vmatprep.subr.bf16.mxu1 %v2368_v4 }
 0x415   :  { %v947_v7 = vpop.f32.mrb[12].mxu0  ;;  %v988_v8 = vpop.f32.mrb[12].mxu1 }
 0x416   :  { %v995_v14 = vadd.f32 %v947_v7, %v2659_v13  ;;  %v997_v15 = vadd.f32 %v988_v8, %v319_v6  ;;  %v949_v16 = vpop.f32.mrb[13].mxu0  ;;  %v990_v17 = vpop.f32.mrb[13].mxu1  ;;  %v2438_v6 = vld [vmem:[#allocation3 + $0xa4] ss:$16 sps:$4 sm:$0xff]   ;;  %v2441_v7 = vld [vmem:[#allocation3 + $0xac] ss:$16 sps:$4 sm:$0xff]  }
 0x417   :  { %v996_v18 = vadd.f32 %v949_v16, %v318_v10  ;;  %v998_v19 = vadd.f32 %v990_v17, %v320_v12  ;;  %v951_v20 = vpop.f32.mrb[14].mxu0  ;;  %v992_v21 = vpop.f32.mrb[14].mxu1  ;;  %v2444_v8 = vld [vmem:[#allocation3 + $0xa0] ss:$16 sps:$4 sm:$0xff]   ;;  %v2450_v10 = vld [vmem:[#allocation3 + $0xc4] ss:$16 sps:$4 sm:$0xff]  }
 0x418   :  { %v1544_v22 = vmul.f32 -1.442695, %v995_v14  ;;  %v952_v23 = vpop.f32.mrb[15].mxu0  ;;  %v993_v24 = vpop.f32.mrb[15].mxu1  ;;  %v1546_v26 = vmul.f32 -1.442695, %v997_v15 }
 0x419   :  { %v1545_v25 = vmul.f32 -1.442695, %v996_v18  ;;  %v2456_v12 = vld [vmem:[#allocation3 + $0xc0] ss:$16 sps:$4 sm:$0xff]   ;;  %v2459_v13 = vld [vmem:[#allocation3 + $0xc8] ss:$16 sps:$4 sm:$0xff]  }
 0x41a   :  { %1666 = vpow2.f32 %v1544_v22  ;;  %v2462_v14 = vld [vmem:[#allocation3 + $0xe4] ss:$16 sps:$4 sm:$0xff]   ;;  %v2465_v15 = vld [vmem:[#allocation3 + $0xec] ss:$16 sps:$4 sm:$0xff]   ;;  %v2468_v16 = vld [vmem:[#allocation3 + $0xe0] ss:$16 sps:$4 sm:$0xff]  }
 0x41b   :  { %1668 = vpow2.f32 %v1545_v25  ;;  %v2471_v17 = vld [vmem:[#allocation3 + $0xe8] ss:$16 sps:$4 sm:$0xff]   ;;  %v2660_v18 = vld [vmem:[#allocation24_spill] sm:$0xff] }
 0x41c   :  { %1670 = vtanh.f32 %v998_v19  ;;  %v323_v19 = vadd.f32 %v2222_v32, %v2660_v18  ;;  %v2661_v22 = vld [vmem:[#allocation25_spill] sm:$0xff]  ;;  %v2662_v24 = vld [vmem:[#allocation27_spill] sm:$0xff] }
 0x41d   :  { %1672 = vpow2.f32 %v1546_v26  ;;  %v322_v23 = vadd.f32 %v2207_v59, %v2661_v22  ;;  %v324_v25 = vadd.f32 %v2227_v55, %v2662_v24  ;;  %v2663_v26 = vld [vmem:[#allocation26_spill] sm:$0xff] }
 0x424   :  { %v1667_v29 = vpop.eup %1666 }
 0x425   :  { %v1008_v30 = vadd.f32 1.0, %v1667_v29  ;;  %v1669_v31 = vpop.eup %1668 }
 0x426   :  { %v1009_v45 = vadd.f32 1.0, %v1669_v31  ;;  %v1671_v27 = vpop.eup %1670 }
 0x427   :  { %1674 = vrcp.f32 %v1008_v30  ;;  %v1673_v52 = vpop.eup %1672 }
 0x428   :  { %1676 = vrcp.f32 %v1009_v45  ;;  %v1010_v50 = vadd.f32 1.0, %v1673_v52 }
 0x42a   :  { %1678 = vrcp.f32 %v1010_v50 }
 0x431   :  { %v1675_v39 = vpop.eup %1674 }
 0x432   :  { %v1019_v63 = vmul.f32 %v1675_v39, %v1671_v27  ;;  %v1677_v49 = vpop.eup %1676 }
 0x433   :  { %v1018_v51 = vmul.f32 %v1677_v49, %v2330_v61  ;;  %v2420_v61 = vld [vmem:[#allocation3 + $0x60] ss:$16 sps:$4 sm:$0xff]  }
 0x434   :  { %v1679_v40 = vpop.eup %1678 }
 0x435   :  { %v2379_v38 = vadd.f32 %v1019_v63, %v1018_v51 }
 0x437   :  { %1680 = vtanh.f32 %v2379_v38 }
 0x441   :  { %v1681_v44 = vpop.eup %1680 }
 0x442   :  { %v1022_v60 = vmul.f32 %v1681_v44, %v1679_v40 }
 0x444   :  { %v1028_v35 = vpack.c.bf16 %v1022_v60, %v1022_v60 }
 0x446   :  { %1062 = vmatmul.mubr.bf16.vlgmr.msra.gmra.mrb[16].mxu0 %v1028_v35  ;;  %1103 = vmatmul.mubr.bf16.vlgmr.msra.gmra.mrb[16].mxu1 %v1028_v35 }
 0x447   :  { %1146 = vmatpush1.bf16.msra.mxu0 %v2382_v36  ;;  %1187 = vmatpush1.bf16.msra.mxu1 %v2385_v57 }
 0x448   :  { %1147 = vmatprep.subr.bf16.mxu0 %v2388_v41  ;;  %1188 = vmatprep.subr.bf16.mxu1 %v2391_v58 }
 0x449   :  { %1177 = vmatprep.mubr.bf16.mxu0 %v2644_v48  ;;  %1218 = vmatprep.mubr.bf16.mxu1 %v2644_v48 }
 0x44b   :  { %1148 = vmatpush1.bf16.msra.mxu0 %v2396_v28  ;;  %1189 = vmatpush1.bf16.msra.mxu1 %v2399_v56 }
 0x44c   :  { %1149 = vmatprep.subr.bf16.mxu0 %v2402_v33  ;;  %1190 = vmatprep.subr.bf16.mxu1 %v2405_v0 }
 0x44f   :  { %1150 = vmatpush1.bf16.msra.mxu0 %v2408_v37  ;;  %1191 = vmatpush1.bf16.msra.mxu1 %v2411_v1 }
 0x450   :  { %1151 = vmatprep.subr.bf16.mxu0 %v2414_v2  ;;  %1192 = vmatprep.subr.bf16.mxu1 %v2417_v62 }
 0x453   :  { %1152 = vmatpush1.bf16.msra.mxu0 %v2420_v61  ;;  %1193 = vmatpush1.bf16.msra.mxu1 %v2423_v43 }
 0x454   :  { %1153 = vmatprep.subr.bf16.mxu0 %v2426_v47  ;;  %1194 = vmatprep.subr.bf16.mxu1 %v2429_v54 }
 0x457   :  { %1154 = vmatpush1.bf16.msra.mxu0 %v2432_v46  ;;  %1195 = vmatpush1.bf16.msra.mxu1 %v2435_v5 }
 0x458   :  { %1155 = vmatprep.subr.bf16.mxu0 %v2438_v6  ;;  %1196 = vmatprep.subr.bf16.mxu1 %v2441_v7 }
 0x45b   :  { %1156 = vmatpush1.bf16.msra.mxu0 %v2444_v8  ;;  %1197 = vmatpush1.bf16.msra.mxu1 %v2447_v9 }
 0x45c   :  { %1157 = vmatprep.subr.bf16.mxu0 %v2450_v10  ;;  %1198 = vmatprep.subr.bf16.mxu1 %v2453_v11 }
 0x45f   :  { %1158 = vmatpush1.bf16.msra.mxu0 %v2456_v12  ;;  %1199 = vmatpush1.bf16.msra.mxu1 %v2459_v13 }
 0x460   :  { %1159 = vmatprep.subr.bf16.mxu0 %v2462_v14  ;;  %1200 = vmatprep.subr.bf16.mxu1 %v2465_v15 }
 0x463   :  { %1160 = vmatpush1.bf16.msra.mxu0 %v2468_v16  ;;  %1201 = vmatpush1.bf16.msra.mxu1 %v2471_v17 }
 0x464   :  { %1261 = vmatprep.subr.bf16.mxu0 %v2365_v3  ;;  %1302 = vmatprep.subr.bf16.mxu1 %v2368_v4 }
 0x519   :  { %v1063_v20 = vpop.f32.mrb[16].mxu0  ;;  %v1104_v21 = vpop.f32.mrb[16].mxu1 }
 0x51a   :  { %v1111_v29 = vadd.f32 %v1063_v20, %v2663_v26  ;;  %v1113_v30 = vadd.f32 %v1104_v21, %v323_v19  ;;  %v1065_v31 = vpop.f32.mrb[17].mxu0  ;;  %v1106_v45 = vpop.f32.mrb[17].mxu1 }
 0x51b   :  { %v1112_v27 = vadd.f32 %v1065_v31, %v322_v23  ;;  %v1114_v52 = vadd.f32 %v1106_v45, %v324_v25  ;;  %v1067_v39 = vpop.f32.mrb[18].mxu0  ;;  %v1108_v63 = vpop.f32.mrb[18].mxu1 }
 0x51c   :  { %v1547_v49 = vmul.f32 -1.442695, %v1111_v29  ;;  %v1068_v50 = vpop.f32.mrb[19].mxu0  ;;  %v1109_v51 = vpop.f32.mrb[19].mxu1  ;;  %v1549_v44 = vmul.f32 -1.442695, %v1113_v30 }
 0x51d   :  { %v1548_v40 = vmul.f32 -1.442695, %v1112_v27  ;;  %v328_v51 = vadd.f32 %v2227_v55, %v2169_v34 }
 0x51e   :  { %1682 = vpow2.f32 %v1547_v49  ;;  %v2665_v49 = vld [vmem:[#allocation29_spill] sm:$0xff] }
 0x51f   :  { %1684 = vpow2.f32 %v1548_v40  ;;  %v326_v50 = vadd.f32 %v2207_v59, %v2665_v49  ;;  %v2666_v40 = vld [vmem:[#allocation30_spill] sm:$0xff] }
 0x520   :  { %1686 = vtanh.f32 %v1114_v52 }
 0x521   :  { %1688 = vpow2.f32 %v1549_v44 }
 0x528   :  { %v1683_v60 = vpop.eup %1682 }
 0x529   :  { %v1124_v35 = vadd.f32 1.0, %v1683_v60  ;;  %v1685_v18 = vpop.eup %1684 }
 0x52a   :  { %v1125_v19 = vadd.f32 1.0, %v1685_v18  ;;  %v1687_v20 = vpop.eup %1686 }
 0x52b   :  { %1690 = vrcp.f32 %v1124_v35  ;;  %v1689_v21 = vpop.eup %1688 }
 0x52c   :  { %1692 = vrcp.f32 %v1125_v19  ;;  %v1126_v25 = vadd.f32 1.0, %v1689_v21 }
 0x52e   :  { %1694 = vrcp.f32 %v1126_v25 }
 0x535   :  { %v1691_v22 = vpop.eup %1690 }
 0x536   :  { %v1135_v23 = vmul.f32 %v1691_v22, %v1687_v20  ;;  %v1693_v24 = vpop.eup %1692 }
 0x537   :  { %v1134_v26 = vmul.f32 %v1693_v24, %v2379_v38  ;;  %v2664_v38 = vld [vmem:[#allocation28_spill] sm:$0xff] }
 0x538   :  { %v1695_v30 = vpop.eup %1694  ;;  %v327_v52 = vadd.f32 %v2222_v32, %v2664_v38 }
 0x539   :  { %v2484_v29 = vadd.f32 %v1135_v23, %v1134_v26 }
 0x53b   :  { %1696 = vtanh.f32 %v2484_v29 }
 0x545   :  { %v1697_v31 = vpop.eup %1696 }
 0x546   :  { %v1138_v45 = vmul.f32 %v1697_v31, %v1695_v30 }
 0x548   :  { %v1144_v27 = vpack.c.bf16 %v1138_v45, %v1138_v45 }
 0x54a   :  { %1178 = vmatmul.mubr.bf16.vlgmr.msra.gmra.mrb[20].mxu0 %v1144_v27  ;;  %1219 = vmatmul.mubr.bf16.vlgmr.msra.gmra.mrb[20].mxu1 %v1144_v27 }
 0x54b   :  { %1262 = vmatpush1.bf16.msra.mxu0 %v2382_v36  ;;  %1303 = vmatpush1.bf16.msra.mxu1 %v2385_v57 }
 0x54c   :  { %1263 = vmatprep.subr.bf16.mxu0 %v2388_v41  ;;  %1304 = vmatprep.subr.bf16.mxu1 %v2391_v58 }
 0x54d   :  { %1293 = vmatprep.mubr.bf16.mxu0 %v2644_v48  ;;  %1334 = vmatprep.mubr.bf16.mxu1 %v2644_v48 }
 0x54f   :  { %1264 = vmatpush1.bf16.msra.mxu0 %v2396_v28  ;;  %1305 = vmatpush1.bf16.msra.mxu1 %v2399_v56 }
 0x550   :  { %1265 = vmatprep.subr.bf16.mxu0 %v2402_v33  ;;  %1306 = vmatprep.subr.bf16.mxu1 %v2405_v0 }
 0x553   :  { %1266 = vmatpush1.bf16.msra.mxu0 %v2408_v37  ;;  %1307 = vmatpush1.bf16.msra.mxu1 %v2411_v1 }
 0x554   :  { %1267 = vmatprep.subr.bf16.mxu0 %v2414_v2  ;;  %1308 = vmatprep.subr.bf16.mxu1 %v2417_v62 }
 0x557   :  { %1268 = vmatpush1.bf16.msra.mxu0 %v2420_v61  ;;  %1309 = vmatpush1.bf16.msra.mxu1 %v2423_v43 }
 0x558   :  { %1269 = vmatprep.subr.bf16.mxu0 %v2426_v47  ;;  %1310 = vmatprep.subr.bf16.mxu1 %v2429_v54 }
 0x55b   :  { %1270 = vmatpush1.bf16.msra.mxu0 %v2432_v46  ;;  %1311 = vmatpush1.bf16.msra.mxu1 %v2435_v5 }
 0x55c   :  { %1271 = vmatprep.subr.bf16.mxu0 %v2438_v6  ;;  %1312 = vmatprep.subr.bf16.mxu1 %v2441_v7 }
 0x55f   :  { %1272 = vmatpush1.bf16.msra.mxu0 %v2444_v8  ;;  %1313 = vmatpush1.bf16.msra.mxu1 %v2447_v9 }
 0x560   :  { %1273 = vmatprep.subr.bf16.mxu0 %v2450_v10  ;;  %1314 = vmatprep.subr.bf16.mxu1 %v2453_v11 }
 0x563   :  { %1274 = vmatpush1.bf16.msra.mxu0 %v2456_v12  ;;  %1315 = vmatpush1.bf16.msra.mxu1 %v2459_v13 }
 0x564   :  { %1275 = vmatprep.subr.bf16.mxu0 %v2462_v14  ;;  %1316 = vmatprep.subr.bf16.mxu1 %v2465_v15 }
 0x567   :  { %1276 = vmatpush1.bf16.msra.mxu0 %v2468_v16  ;;  %1317 = vmatpush1.bf16.msra.mxu1 %v2471_v17 }
 0x568   :  { %1377 = vmatprep.subr.bf16.mxu0 %v2365_v3  ;;  %1418 = vmatprep.subr.bf16.mxu1 %v2368_v4 }
 0x61d   :  { %v1179_v39 = vpop.f32.mrb[20].mxu0  ;;  %v1220_v63 = vpop.f32.mrb[20].mxu1 }
 0x61e   :  { %v1227_v44 = vadd.f32 %v1179_v39, %v2666_v40  ;;  %v1229_v60 = vadd.f32 %v1220_v63, %v327_v52  ;;  %v1181_v35 = vpop.f32.mrb[21].mxu0  ;;  %v1222_v18 = vpop.f32.mrb[21].mxu1 }
 0x61f   :  { %v1228_v19 = vadd.f32 %v1181_v35, %v326_v50  ;;  %v1230_v3 = vadd.f32 %v1222_v18, %v328_v51  ;;  %v1183_v20 = vpop.f32.mrb[22].mxu0  ;;  %v1224_v4 = vpop.f32.mrb[22].mxu1 }
 0x620   :  { %v1550_v21 = vmul.f32 -1.442695, %v1227_v44  ;;  %v1184_v22 = vpop.f32.mrb[23].mxu0  ;;  %v1225_v23 = vpop.f32.mrb[23].mxu1  ;;  %v1552_v25 = vmul.f32 -1.442695, %v1229_v60 }
 0x621   :  { %v1551_v24 = vmul.f32 -1.442695, %v1228_v19  ;;  %v2669_v19 = vld [vmem:[#allocation33_spill] sm:$0xff]  ;;  %v2671_v23 = vld [vmem:[#allocation35_spill] sm:$0xff] }
 0x622   :  { %1698 = vpow2.f32 %v1550_v21  ;;  %v2670_v21 = vld [vmem:[#allocation34_spill] sm:$0xff] }
 0x623   :  { %1700 = vpow2.f32 %v1551_v24  ;;  %v334_v22 = vadd.f32 %v2207_v59, %v2670_v21  ;;  %v336_v24 = vadd.f32 %v2227_v55, %v2671_v23 }
 0x624   :  { %1702 = vtanh.f32 %v1230_v3  ;;  %v335_v3 = vadd.f32 %v2222_v32, %v2669_v19 }
 0x625   :  { %1704 = vpow2.f32 %v1552_v25  ;;  %v2672_v25 = vld [vmem:[#allocation36_spill] sm:$0xff] }
 0x62c   :  { %v1699_v26 = vpop.eup %1698 }
 0x62d   :  { %v1240_v30 = vadd.f32 1.0, %v1699_v26  ;;  %v1701_v34 = vpop.eup %1700 }
 0x62e   :  { %v1241_v31 = vadd.f32 1.0, %v1701_v34  ;;  %v1703_v45 = vpop.eup %1702 }
 0x62f   :  { %1706 = vrcp.f32 %v1240_v30  ;;  %v1705_v27 = vpop.eup %1704 }
 0x630   :  { %1708 = vrcp.f32 %v1241_v31  ;;  %v1242_v63 = vadd.f32 1.0, %v1705_v27 }
 0x632   :  { %1710 = vrcp.f32 %v1242_v63 }
 0x639   :  { %v1707_v38 = vpop.eup %1706 }
 0x63a   :  { %v1251_v52 = vmul.f32 %v1707_v38, %v1703_v45  ;;  %v1709_v39 = vpop.eup %1708 }
 0x63b   :  { %v1250_v49 = vmul.f32 %v1709_v39, %v2484_v29 }
 0x63c   :  { %v1711_v51 = vpop.eup %1710 }
 0x63d   :  { %v2529_v50 = vadd.f32 %v1251_v52, %v1250_v49 }
 0x63f   :  { %1712 = vtanh.f32 %v2529_v50 }
 0x649   :  { %v1713_v40 = vpop.eup %1712 }
 0x64a   :  { %v1254_v44 = vmul.f32 %v1713_v40, %v1711_v51 }
 0x64c   :  { %v1260_v60 = vpack.c.bf16 %v1254_v44, %v1254_v44 }
 0x64e   :  { %1294 = vmatmul.mubr.bf16.vlgmr.msra.gmra.mrb[24].mxu0 %v1260_v60  ;;  %1335 = vmatmul.mubr.bf16.vlgmr.msra.gmra.mrb[24].mxu1 %v1260_v60 }
 0x64f   :  { %1378 = vmatpush1.bf16.msra.mxu0 %v2382_v36  ;;  %1419 = vmatpush1.bf16.msra.mxu1 %v2385_v57 }
 0x650   :  { %1379 = vmatprep.subr.bf16.mxu0 %v2388_v41  ;;  %1420 = vmatprep.subr.bf16.mxu1 %v2391_v58  ;;  %v2667_v41 = vld [vmem:[#allocation31_spill] sm:$0xff] }
 0x651   :  { %1409 = vmatprep.mubr.bf16.mxu0 %v2644_v48  ;;  %1450 = vmatprep.mubr.bf16.mxu1 %v2644_v48  ;;  %v331_v48 = vadd.f32 %v2222_v32, %v2171_v53  ;;  %v330_v58 = vadd.f32 %v2207_v59, %v2667_v41 }
 0x653   :  { %1380 = vmatpush1.bf16.msra.mxu0 %v2396_v28  ;;  %1421 = vmatpush1.bf16.msra.mxu1 %v2399_v56  ;;  %v332_v28 = vadd.f32 %v2227_v55, %v2186_v42  ;;  %v2668_v56 = vld [vmem:[#allocation32_spill] sm:$0xff] }
 0x654   :  { %1381 = vmatprep.subr.bf16.mxu0 %v2402_v33  ;;  %1422 = vmatprep.subr.bf16.mxu1 %v2405_v0 }
 0x657   :  { %1382 = vmatpush1.bf16.msra.mxu0 %v2408_v37  ;;  %1423 = vmatpush1.bf16.msra.mxu1 %v2411_v1 }
 0x658   :  { %1383 = vmatprep.subr.bf16.mxu0 %v2414_v2  ;;  %1424 = vmatprep.subr.bf16.mxu1 %v2417_v62 }
 0x65b   :  { %1384 = vmatpush1.bf16.msra.mxu0 %v2420_v61  ;;  %1425 = vmatpush1.bf16.msra.mxu1 %v2423_v43 }
 0x65c   :  { %1385 = vmatprep.subr.bf16.mxu0 %v2426_v47  ;;  %1426 = vmatprep.subr.bf16.mxu1 %v2429_v54 }
 0x65f   :  { %1386 = vmatpush1.bf16.msra.mxu0 %v2432_v46  ;;  %1427 = vmatpush1.bf16.msra.mxu1 %v2435_v5 }
 0x660   :  { %1387 = vmatprep.subr.bf16.mxu0 %v2438_v6  ;;  %1428 = vmatprep.subr.bf16.mxu1 %v2441_v7 }
 0x663   :  { %1388 = vmatpush1.bf16.msra.mxu0 %v2444_v8  ;;  %1429 = vmatpush1.bf16.msra.mxu1 %v2447_v9 }
 0x664   :  { %1389 = vmatprep.subr.bf16.mxu0 %v2450_v10  ;;  %1430 = vmatprep.subr.bf16.mxu1 %v2453_v11 }
 0x667   :  { %1390 = vmatpush1.bf16.msra.mxu0 %v2456_v12  ;;  %1431 = vmatpush1.bf16.msra.mxu1 %v2459_v13 }
 0x668   :  { %1391 = vmatprep.subr.bf16.mxu0 %v2462_v14  ;;  %1432 = vmatprep.subr.bf16.mxu1 %v2465_v15 }
 0x66b   :  { %1392 = vmatpush1.bf16.msra.mxu0 %v2468_v16  ;;  %1433 = vmatpush1.bf16.msra.mxu1 %v2471_v17 }
 0x721   :  { %v1295_v36 = vpop.f32.mrb[24].mxu0  ;;  %v1336_v57 = vpop.f32.mrb[24].mxu1 }
 0x722   :  { %v1343_v33 = vadd.f32 %v1295_v36, %v2668_v56  ;;  %v1345_v0 = vadd.f32 %v1336_v57, %v331_v48  ;;  %v1297_v37 = vpop.f32.mrb[25].mxu0  ;;  %v1338_v1 = vpop.f32.mrb[25].mxu1 }
 0x723   :  { %v1344_v2 = vadd.f32 %v1297_v37, %v330_v58  ;;  %v1346_v62 = vadd.f32 %v1338_v1, %v332_v28  ;;  %v1299_v61 = vpop.f32.mrb[26].mxu0  ;;  %v1340_v43 = vpop.f32.mrb[26].mxu1 }
 0x724   :  { %v1553_v47 = vmul.f32 -1.442695, %v1343_v33  ;;  %v1300_v54 = vpop.f32.mrb[27].mxu0  ;;  %v1341_v53 = vpop.f32.mrb[27].mxu1  ;;  %v1555_v5 = vmul.f32 -1.442695, %v1345_v0 }
 0x725   :  { %v1554_v46 = vmul.f32 -1.442695, %v1344_v2 }
 0x726   :  { %1714 = vpow2.f32 %v1553_v47 }
 0x727   :  { %1716 = vpow2.f32 %v1554_v46 }
 0x728   :  { %1718 = vtanh.f32 %v1346_v62 }
 0x729   :  { %1720 = vpow2.f32 %v1555_v5 }
 0x730   :  { %v1715_v6 = vpop.eup %1714 }
 0x731   :  { %v1356_v7 = vadd.f32 1.0, %v1715_v6  ;;  %v1717_v42 = vpop.eup %1716 }
 0x732   :  { %v1357_v8 = vadd.f32 1.0, %v1717_v42  ;;  %v1719_v9 = vpop.eup %1718 }
 0x733   :  { %1722 = vrcp.f32 %v1356_v7  ;;  %v1721_v10 = vpop.eup %1720 }
 0x734   :  { %1724 = vrcp.f32 %v1357_v8  ;;  %v1358_v14 = vadd.f32 1.0, %v1721_v10 }
 0x736   :  { %1726 = vrcp.f32 %v1358_v14 }
 0x73d   :  { %v1723_v11 = vpop.eup %1722 }
 0x73e   :  { %v1367_v12 = vmul.f32 %v1723_v11, %v1719_v9  ;;  %v1725_v13 = vpop.eup %1724 }
 0x73f   :  { %v1366_v15 = vmul.f32 %v1725_v13, %v2529_v50 }
 0x740   :  { %v1727_v17 = vpop.eup %1726 }
 0x741   :  { %v1368_v16 = vadd.f32 %v1367_v12, %v1366_v15 }
 0x743   :  { %1728 = vtanh.f32 %v1368_v16 }
 0x74d   :  { %v1729_v29 = vpop.eup %1728 }
 0x74e   :  { %v1370_v35 = vmul.f32 %v1729_v29, %v1727_v17 }
 0x750   :  { %v1376_v18 = vpack.c.bf16 %v1370_v35, %v1370_v35 }
 0x752   :  { %1410 = vmatmul.mubr.bf16.vlgmr.msra.gmra.mrb[28].mxu0 %v1376_v18  ;;  %1451 = vmatmul.mubr.bf16.vlgmr.msra.gmra.mrb[28].mxu1 %v1376_v18 }
 0x825   :  { %v1411_v20 = vpop.f32.mrb[28].mxu0  ;;  %v1452_v4 = vpop.f32.mrb[28].mxu1 }
 0x826   :  { %v1459_v26 = vadd.f32 %v1411_v20, %v2672_v25  ;;  %v1461_v30 = vadd.f32 %v1452_v4, %v335_v3  ;;  %v1413_v34 = vpop.f32.mrb[29].mxu0  ;;  %v1454_v31 = vpop.f32.mrb[29].mxu1 }
 0x827   :  { %v1460_v45 = vadd.f32 %v1413_v34, %v334_v22  ;;  %v1462_v27 = vadd.f32 %v1454_v31, %v336_v24  ;;  %v1415_v38 = vpop.f32.mrb[30].mxu0  ;;  %v1456_v52 = vpop.f32.mrb[30].mxu1 }
 0x828   :  { %v1556_v39 = vmul.f32 -1.442695, %v1459_v26  ;;  %v1416_v63 = vpop.f32.mrb[31].mxu0  ;;  %v1457_v32 = vpop.f32.mrb[31].mxu1  ;;  %v1558_v50 = vmul.f32 -1.442695, %v1461_v30 }
 0x829   :  { %v1557_v49 = vmul.f32 -1.442695, %v1460_v45 }
 0x82a   :  { %1730 = vpow2.f32 %v1556_v39 }
 0x82b   :  { %1732 = vpow2.f32 %v1557_v49 }
 0x82c   :  { %1734 = vtanh.f32 %v1462_v27 }
 0x82d   :  { %1736 = vpow2.f32 %v1558_v50 }
 0x834   :  { %v1731_v59 = vpop.eup %1730 }
 0x835   :  { %v1472_v51 = vadd.f32 1.0, %v1731_v59  ;;  %v1733_v55 = vpop.eup %1732 }
 0x836   :  { %v1473_v40 = vadd.f32 1.0, %v1733_v55  ;;  %v1735_v44 = vpop.eup %1734 }
 0x837   :  { %1738 = vrcp.f32 %v1472_v51  ;;  %v1737_v60 = vpop.eup %1736 }
 0x838   :  { %1740 = vrcp.f32 %v1473_v40  ;;  %v1474_v41 = vadd.f32 1.0, %v1737_v60 }
 0x83a   :  { %1742 = vrcp.f32 %v1474_v41 }
 0x841   :  { %v1739_v48 = vpop.eup %1738 }
 0x842   :  { %v1483_v36 = vmul.f32 %v1739_v48, %v1735_v44  ;;  %v1741_v57 = vpop.eup %1740 }
 0x843   :  { %v1482_v58 = vmul.f32 %v1741_v57, %v1368_v16 }
 0x844   :  { %v1743_v56 = vpop.eup %1742 }
 0x845   :  { %v1484_v28 = vadd.f32 %v1483_v36, %v1482_v58 }
 0x847   :  { %1744 = vtanh.f32 %v1484_v28 }
 0x851   :  { %v1745_v33 = vpop.eup %1744 }
 0x852   :  { %v1486_v0 = vmul.f32 %v1745_v33, %v1743_v56 }
 0x854   :  { %1487 = vst [vmem:[#allocation6] sm:$0xff] %v1486_v0 }
 0x855   :  { %1811 = shalt.err (!%p1808_p12)
}
 0x856   :  { %s1812_s24 = scalar_lea.hbm %s2595_s4, 128 }
 0x857   :  { %p1813_p13 = scmp.ne.s32.totalorder %s2595_s4, %s1812_s24  ;;  %p1816_p0 = scmp.lt.u32.totalorder %s1812_s24, %s2595_s4 }
 0x859   :  { %p1818_p1 = pnand %p1816_p0, %p1813_p13 }
 0x85b   :  { %1821 = shalt.err (!%p1818_p1)
}
 0x85c   :  { %1497 = dma.vmem_to_hbm [thread:$0]  %s1495_s20, 128, %s2595_s4, [#allocation5]  }
 0x85d   :  { %1824 = dma.done.wait [#allocation5], 128  }
 0x85e   :  { %1825 = vsyncadd [#allocation5], 4294967168 }
 0x85f   :  { %1501 = vsyncpa [#allocation4], 1 }
 0x860   :  { %1502 = vsyncpa [#allocation5], 1 }

</bundles_post_ra>
